<compile_context>
chip_gen: v6e
topology: v6e:2x2x1
jax: 0.10.0
libtpu: 0.0.40
codegen_flags: <defaults>
</compile_context>

<pallas_src>
import functools

import jax
import jax.numpy as jnp
from jax.experimental import pallas as pl
from jax.experimental.pallas import tpu as pltpu


_TILE_ROWS = 8  # output rows processed per grid step


# ----------------------------------------------------------------------------
# In-kernel helpers and capability probes
# ----------------------------------------------------------------------------
def _upsample2x_value(v):
    """Nearest 2x upsample of an in-register (H, W, C) value (rows then columns)."""
    h, w, c = v.shape
    v = jnp.broadcast_to(v[:, None, :, :], (h, 2, w, c)).reshape(2 * h, w, c)
    v = jnp.broadcast_to(v[:, :, None, :], (2 * h, w, 2, c)).reshape(2 * h, 2 * w, c)
    return v


@functools.lru_cache(maxsize=None)
def _scratch_pad_store_ok():
    """Probe: zero a VMEM scratch and store a tile at offset (1, 1) (in-kernel padding)."""
    h, w, c = 8, 12, 24
    dt = jnp.bfloat16

    def probe_kernel(x_ref, o_ref, pad_ref):
        pad_ref[...] = jnp.zeros_like(pad_ref)
        pad_ref[1:h + 1, 1:w + 1, :] = x_ref[...]
        o_ref[...] = pad_ref[...]

    try:
        x = (jnp.arange(h * w * c, dtype=jnp.float32).reshape(h, w, c) % 63.0).astype(dt)
        out = pl.pallas_call(
            probe_kernel,
            out_shape=jax.ShapeDtypeStruct((h + 2, w + 2, c), dt),
            scratch_shapes=[pltpu.VMEM((h + 2, w + 2, c), dt)],
        )(x)
        out = jax.block_until_ready(out)
        ref = jnp.pad(x, ((1, 1), (1, 1), (0, 0)))
        return bool(jnp.all(out == ref))
    except Exception:
        return False


@functools.lru_cache(maxsize=None)
def _inkernel_upsample_ok(hh, wh, c, dtype_name):
    """Probe: nearest-2x upsample in-register + padded offset store into a VMEM scratch."""
    dt = jnp.dtype(dtype_name)
    hp, wp = 2 * hh + 2, 2 * wh + 2

    def probe_kernel(x_ref, o_ref, pad_ref):
        pad_ref[...] = jnp.zeros_like(pad_ref)
        pad_ref[1:2 * hh + 1, 1:2 * wh + 1, :] = _upsample2x_value(x_ref[...])
        o_ref[...] = pad_ref[...]

    try:
        x = (jnp.arange(hh * wh * c, dtype=jnp.float32).reshape(hh, wh, c) % 63.0).astype(dt)
        out = pl.pallas_call(
            probe_kernel,
            out_shape=jax.ShapeDtypeStruct((hp, wp, c), dt),
            scratch_shapes=[pltpu.VMEM((hp, wp, c), dt)],
        )(x)
        out = jax.block_until_ready(out)
        ref = jnp.pad(jnp.repeat(jnp.repeat(x, 2, axis=0), 2, axis=1),
                      ((1, 1), (1, 1), (0, 0)))
        return bool(jnp.all(out == ref))
    except Exception:
        return False


# ----------------------------------------------------------------------------
# Fused kernel: [optional nearest-2x upsample of input 0] + pad(1) + split-Cin
#               Conv3x3 (9 shifted MXU matmuls per input, f32 acc) + bias + ReLU
# ----------------------------------------------------------------------------
def _make_fused_conv_kernel(n_in, upsample_in_kernel, prepadded, ts, H, W, Cout):
    def kernel(*args):
        x_refs = args[:n_in]
        w_refs = args[n_in:2 * n_in]
        bias_ref = args[2 * n_in]
        o_ref = args[2 * n_in + 1]
        pad_refs = args[2 * n_in + 2:]
        s = pl.program_id(1)

        if not prepadded:
            # Build the zero-padded (and, for input 0, upsampled) inputs once per image.
            # This replaces the HBM-side jnp.pad / jnp.repeat / concat of the old version.
            @pl.when(s == 0)
            def _build():
                for t in range(n_in):
                    pad_refs[t][...] = jnp.zeros_like(pad_refs[t])
                    v = x_refs[t][0]
                    if t == 0 and upsample_in_kernel:
                        v = _upsample2x_value(v)
                    pad_refs[t][1:H + 1, 1:W + 1, :] = v

        r0 = s * ts
        bias = bias_ref[...].reshape(1, 1, Cout)
        acc = jnp.zeros((ts, W, Cout), jnp.float32)
        # conv(concat(inputs), W) == sum_t conv(input_t, W_t): 9 shifted matmuls per input.
        for t in range(n_in):
            for dh in range(3):
                for dw in range(3):
                    if prepadded:
                        xs = x_refs[t][0, pl.ds(r0 + dh, ts), pl.ds(dw, W), :]
                    else:
                        xs = pad_refs[t][pl.ds(r0 + dh, ts), pl.ds(dw, W), :]
                    acc = acc + jax.lax.dot_general(
                        xs, w_refs[t][dh * 3 + dw],
                        dimension_numbers=(((2,), (0,)), ((), ())),
                        preferred_element_type=jnp.float32)
        o_ref[0] = jnp.maximum(acc + bias, 0.0).astype(o_ref.dtype)

    return kernel


def fused_conv3x3_bn_relu(inputs, upsample_first, w, bias):
    """Fused conv layer.

    inputs: list of NHWC bf16 tensors (the logical concat, kept as separate arrays);
            inputs[0] is half-resolution when `upsample_first`.
    w:      (3, 3, sum(Cin_t), Cout) bf16 with the BN scale already folded in.
    bias:   (Cout,) float32 folded BN bias.
    """
    N = int(inputs[0].shape[0])
    dtype = inputs[0].dtype
    use_scratch = _scratch_pad_store_ok()

    upsample_in_kernel = False
    if upsample_first:
        hh, wh, c0 = (int(d) for d in inputs[0].shape[1:])
        H, W = 2 * hh, 2 * wh
        upsample_in_kernel = use_scratch and _inkernel_upsample_ok(hh, wh, c0, str(dtype))
        if not upsample_in_kernel:
            # TODO(synk): sublane-factor-2 interleave for nearest upsample did not lower on
            # this Mosaic build; fall back to one XLA-side upsample round trip for this input.
            inputs = [jnp.repeat(jnp.repeat(inputs[0], 2, axis=1), 2, axis=2)] + list(inputs[1:])
    else:
        H, W = (int(d) for d in inputs[0].shape[1:3])

    Cout = int(w.shape[-1])
    chans = [int(t.shape[-1]) for t in inputs]
    assert int(w.shape[2]) == sum(chans)
    for t in inputs[1:]:
        assert (int(t.shape[1]), int(t.shape[2])) == (H, W)

    # Split the BN-folded weights along Cin: conv(concat) == sum of partial convs.
    w_parts, off = [], 0
    for c in chans:
        w_parts.append(w[:, :, off:off + c, :].reshape(9, c, Cout))
        off += c
    bias2 = bias.reshape(1, Cout).astype(jnp.float32)

    ts = _TILE_ROWS if H % _TILE_ROWS == 0 else H
    n_strips = H // ts
    n_in = len(inputs)

    if use_scratch:
        conv_inputs = list(inputs)
        scratch_shapes = [pltpu.VMEM((H + 2, W + 2, c), dtype) for c in chans]
    else:
        # Fallback: pre-pad each input in XLA (previous, proven scheme); concat fusion,
        # bf16, BN fold and H-strips are still in effect.
        conv_inputs = [jnp.pad(x, ((0, 0), (1, 1), (1, 1), (0, 0))) for x in inputs]
        scratch_shapes = []

    in_specs = []
    for x in conv_inputs:
        _, ht, wt, ct = (int(d) for d in x.shape)
        in_specs.append(pl.BlockSpec((1, ht, wt, ct), lambda n, s: (n, 0, 0, 0)))
    for wp in w_parts:
        in_specs.append(pl.BlockSpec(tuple(int(d) for d in wp.shape), lambda n, s: (0, 0, 0)))
    in_specs.append(pl.BlockSpec((1, Cout), lambda n, s: (0, 0)))

    kernel = _make_fused_conv_kernel(
        n_in, upsample_in_kernel, not use_scratch, ts, H, W, Cout)

    return pl.pallas_call(
        kernel,
        out_shape=jax.ShapeDtypeStruct((N, H, W, Cout), dtype),
        grid=(N, n_strips),
        in_specs=in_specs,
        out_specs=pl.BlockSpec((1, ts, W, Cout), lambda n, s: (n, s, 0, 0)),
        scratch_shapes=scratch_shapes,
        compiler_params=pltpu.CompilerParams(
            dimension_semantics=("parallel", "arbitrary")),
    )(*conv_inputs, *w_parts, bias2)


# ----------------------------------------------------------------------------
# DecoderBlock (attention_type=None -> Identity attention, center=False)
# ----------------------------------------------------------------------------
def decoder_block(params, x, skips):
    # First conv consumes [upsampled x] + skips without ever concatenating in HBM.
    y = fused_conv3x3_bn_relu([x] + list(skips), True, params["w1"], params["b1"])
    y = fused_conv3x3_bn_relu([y], False, params["w2"], params["b2"])
    return y


# ----------------------------------------------------------------------------
# Deterministic parameter construction (mirrors UnetPlusPlusDecoder.__init__)
# ----------------------------------------------------------------------------
def _make_conv_bn(key, cin, cout):
    k_w, k_g, k_b, k_m, k_v = jax.random.split(key, 5)
    w = jax.random.normal(k_w, (3, 3, cin, cout), jnp.float32) * 0.1
    gamma = 1.0 + 0.05 * jax.random.normal(k_g, (cout,), jnp.float32)
    beta = 0.05 * jax.random.normal(k_b, (cout,), jnp.float32)
    r_mean = 0.05 * jax.random.normal(k_m, (cout,), jnp.float32)
    r_var = 1.0 + 0.1 * jax.random.uniform(k_v, (cout,), jnp.float32)
    eps = 1e-5
    scale = gamma / jnp.sqrt(r_var + eps)          # eval-mode BN folded to affine
    bias = beta - r_mean * scale
    w_folded = (w * scale[None, None, None, :]).astype(jnp.bfloat16)  # fold scale into weights
    return w_folded, bias.astype(jnp.float32)


def _make_block_params(key, conv1_in, out_ch):
    k1, k2 = jax.random.split(key)
    w1, b1 = _make_conv_bn(k1, conv1_in, out_ch)
    w2, b2 = _make_conv_bn(k2, out_ch, out_ch)
    return {"w1": w1, "b1": b1, "w2": w2, "b2": b2}


def build_unetpp_decoder(key, encoder_channels, decoder_channels):
    enc = list(encoder_channels[1:])[::-1]
    head = enc[0]
    in_channels = [head] + list(decoder_channels[:-1])
    skip_channels = list(enc[1:]) + [0]
    out_channels = list(decoder_channels)

    blocks = {}
    for layer_idx in range(len(in_channels) - 1):
        for depth_idx in range(layer_idx + 1):
            if depth_idx == 0:
                in_ch = in_channels[layer_idx]
                skip_ch = skip_channels[layer_idx] * (layer_idx + 1)
                out_ch = out_channels[layer_idx]
            else:
                out_ch = skip_channels[layer_idx]
                skip_ch = skip_channels[layer_idx] * (layer_idx + 1 - depth_idx)
                in_ch = skip_channels[layer_idx - 1]
            key, sub = jax.random.split(key)
            blocks[f"x_{depth_idx}_{layer_idx}"] = _make_block_params(
                sub, in_ch + skip_ch, out_ch)
    key, sub = jax.random.split(key)
    blocks[f"x_{0}_{len(in_channels) - 1}"] = _make_block_params(
        sub, in_channels[-1], out_channels[-1])
    depth = len(in_channels) - 1
    return blocks, depth


# ----------------------------------------------------------------------------
# UnetPlusPlusDecoder.forward (dense nested skip connections; skips kept as lists)
# ----------------------------------------------------------------------------
def unetpp_decoder_forward(blocks, depth, features_nhwc, block_fn):
    feats = list(features_nhwc[1:])[::-1]   # drop stem feature, reverse (deepest first)
    dense_x = {}
    for layer_idx in range(depth):
        for depth_idx in range(depth - layer_idx):
            if layer_idx == 0:
                dense_x[f"x_{depth_idx}_{depth_idx}"] = block_fn(
                    blocks[f"x_{depth_idx}_{depth_idx}"],
                    feats[depth_idx], [feats[depth_idx + 1]])
            else:
                dli = depth_idx + layer_idx
                skips = [dense_x[f"x_{idx}_{dli}"] for idx in range(depth_idx + 1, dli + 1)]
                skips.append(feats[dli + 1])
                dense_x[f"x_{depth_idx}_{dli}"] = block_fn(
                    blocks[f"x_{depth_idx}_{dli}"],
                    dense_x[f"x_{depth_idx}_{dli - 1}"], skips)
    dense_x[f"x_0_{depth}"] = block_fn(blocks[f"x_0_{depth}"], dense_x[f"x_0_{depth - 1}"], [])
    return dense_x[f"x_0_{depth}"]


# ----------------------------------------------------------------------------
# Pure-JAX (XLA) reference with identical params / dtypes for cross-checking
# ----------------------------------------------------------------------------
def _ref_conv_bn_relu(x, w, bias):
    y = jax.lax.conv_general_dilated(
        x, w, window_strides=(1, 1), padding=((1, 1), (1, 1)),
        dimension_numbers=("NHWC", "HWIO", "NHWC"),
        preferred_element_type=jnp.float32)
    y = jnp.maximum(y + bias.reshape(1, 1, 1, -1), 0.0)
    return y.astype(x.dtype)


def _ref_block(params, x, skips):
    x = jnp.repeat(jnp.repeat(x, 2, axis=1), 2, axis=2)
    if skips:
        x = jnp.concatenate([x] + list(skips), axis=-1)
    x = _ref_conv_bn_relu(x, params["w1"], params["b1"])
    return _ref_conv_bn_relu(x, params["w2"], params["b2"])


# ----------------------------------------------------------------------------
# Main
# ----------------------------------------------------------------------------
if __name__ == "__main__":
    key = jax.random.PRNGKey(0)

    # Small synthetic config: n_blocks = 3
    encoder_channels = (3, 8, 16, 32)
    decoder_channels = (24, 16, 8)
    batch = 2

    # Encoder features (PyTorch NCHW convention), spatially halving per stage.
    k0, k1, k2, k3, kp = jax.random.split(key, 5)
    f0 = jax.random.normal(k0, (batch, 3, 32, 32), jnp.float32)   # stem (dropped by decoder)
    f1 = jax.random.normal(k1, (batch, 8, 16, 16), jnp.float32)
    f2 = jax.random.normal(k2, (batch, 16, 8, 8), jnp.float32)
    f3 = jax.random.normal(k3, (batch, 32, 4, 4), jnp.float32)
    features_nchw = (f0, f1, f2, f3)

    blocks, depth = build_unetpp_decoder(kp, encoder_channels, decoder_channels)

    # NCHW -> NHWC and bf16 storage (f32 accumulation inside the kernels).
    features_nhwc = tuple(
        jnp.transpose(f, (0, 2, 3, 1)).astype(jnp.bfloat16) for f in features_nchw)

    out_nhwc = unetpp_decoder_forward(blocks, depth, features_nhwc, decoder_block)
    out_nchw = jnp.transpose(out_nhwc, (0, 3, 1, 2))              # back to PyTorch layout
    out_nchw = jax.block_until_ready(out_nchw)

    assert out_nchw.shape == (batch, decoder_channels[-1], 32, 32), out_nchw.shape
    assert bool(jnp.all(jnp.isfinite(out_nchw.astype(jnp.float32))))

    # Cross-check against the XLA reference (same bf16 params / activations, f32 accumulate).
    ref_nhwc = unetpp_decoder_forward(blocks, depth, features_nhwc, _ref_block)
    err = jnp.max(jnp.abs(out_nhwc.astype(jnp.float32) - ref_nhwc.astype(jnp.float32)))
    ref_mag = jnp.max(jnp.abs(ref_nhwc.astype(jnp.float32))) + 1e-6
    rel = float(err / ref_mag)
    assert rel < 2e-2, f"kernel/reference mismatch: normalized max err {rel}"

    print("KERNEL_OK")
</pallas_src>

<mosaic_0001>
module attributes {stable_mosaic.version = 11 : i64} {
  func.func @probe_kernel(%arg0: memref<8x12x24xbf16, #tpu.memory_space<vmem>>, %arg1: memref<10x14x24xbf16, #tpu.memory_space<vmem>>, %arg2: memref<10x14x24xbf16, #tpu.memory_space<vmem>>) attributes {dimension_semantics = [], scalar_prefetch = 0 : i64, scratch_operands = 1 : i64, tpu.core_type = #tpu.core_type<tc>} {
    %cst = arith.constant 0.000000e+00 : bf16
    %0 = vector.broadcast %cst : bf16 to vector<10x14x24xbf16>
    %c0 = arith.constant 0 : index
    %c0_0 = arith.constant 0 : index
    %c0_1 = arith.constant 0 : index
    %1 = vector.load %arg2[%c0, %c0_0, %c0_1] : memref<10x14x24xbf16, #tpu.memory_space<vmem>>, vector<10x14x24xbf16>
    tpu.vector_store %arg2[%c0, %c0_0, %c0_1], %0 {strides = array<i32>} : memref<10x14x24xbf16, #tpu.memory_space<vmem>>, vector<10x14x24xbf16>,
    %c0_2 = arith.constant 0 : index
    %c0_3 = arith.constant 0 : index
    %c0_4 = arith.constant 0 : index
    %2 = vector.load %arg0[%c0_2, %c0_3, %c0_4] : memref<8x12x24xbf16, #tpu.memory_space<vmem>>, vector<8x12x24xbf16>
    %c1 = arith.constant 1 : index
    %c1_5 = arith.constant 1 : index
    %c0_6 = arith.constant 0 : index
    %3 = vector.load %arg2[%c1, %c1_5, %c0_6] : memref<10x14x24xbf16, #tpu.memory_space<vmem>>, vector<8x12x24xbf16>
    tpu.vector_store %arg2[%c1, %c1_5, %c0_6], %2 {strides = array<i32>} : memref<10x14x24xbf16, #tpu.memory_space<vmem>>, vector<8x12x24xbf16>,
    %c0_7 = arith.constant 0 : index
    %c0_8 = arith.constant 0 : index
    %c0_9 = arith.constant 0 : index
    %4 = vector.load %arg2[%c0_7, %c0_8, %c0_9] : memref<10x14x24xbf16, #tpu.memory_space<vmem>>, vector<10x14x24xbf16>
    %c0_10 = arith.constant 0 : index
    %c0_11 = arith.constant 0 : index
    %c0_12 = arith.constant 0 : index
    %5 = vector.load %arg1[%c0_10, %c0_11, %c0_12] : memref<10x14x24xbf16, #tpu.memory_space<vmem>>, vector<10x14x24xbf16>
    tpu.vector_store %arg1[%c0_10, %c0_11, %c0_12], %4 {strides = array<i32>} : memref<10x14x24xbf16, #tpu.memory_space<vmem>>, vector<10x14x24xbf16>,
    return
  }
}

module attributes {stable_mosaic.version = 11 : i64} {
  func.func @kernel(%arg0: i32, %arg1: i32, %arg2: memref<1x10x10x32xbf16, #tpu.memory_space<vmem>>, %arg3: memref<1x10x10x16xbf16, #tpu.memory_space<vmem>>, %arg4: memref<9x32x24xbf16, #tpu.memory_space<vmem>>, %arg5: memref<9x16x24xbf16, #tpu.memory_space<vmem>>, %arg6: memref<1x24xf32, #tpu.memory_space<vmem>>, %arg7: memref<1x8x8x24xbf16, #tpu.memory_space<vmem>>) attributes {dimension_semantics = [#tpu.dimension_semantics<parallel>, #tpu.dimension_semantics<arbitrary>], iteration_bounds = array<i64: 2, 1>, scalar_prefetch = 0 : i64, scratch_operands = 0 : i64, tpu.core_type = #tpu.core_type<tc>, window_params = [{transform_indices = @transform_0, window_bounds = array<i64: 1, 10, 10, 32>}, {transform_indices = @transform_1, window_bounds = array<i64: 1, 10, 10, 16>}, {pipeline_mode = #tpu.pipeline_mode<synchronous>, transform_indices = @transform_2, window_bounds = array<i64: 9, 32, 24>}, {pipeline_mode = #tpu.pipeline_mode<synchronous>, transform_indices = @transform_3, window_bounds = array<i64: 9, 16, 24>}, {pipeline_mode = #tpu.pipeline_mode<synchronous>, transform_indices = @transform_4, window_bounds = array<i64: 1, 24>}, {transform_indices = @transform_5, window_bounds = array<i64: 1, 8, 8, 24>}]} {
    %c8_i32 = arith.constant 8 : i32
    %0 = arith.muli %arg1, %c8_i32 : i32
    %c0 = arith.constant 0 : index
    %c0_0 = arith.constant 0 : index
    %1 = vector.load %arg6[%c0, %c0_0] : memref<1x24xf32, #tpu.memory_space<vmem>>, vector<1x24xf32>
    %2 = vector.shape_cast %1 : vector<1x24xf32> to vector<1x1x24xf32>
    %cst = arith.constant 0.000000e+00 : f32
    %3 = vector.broadcast %cst : f32 to vector<8x8x24xf32>
    %c0_i32 = arith.constant 0 : i32
    %4 = arith.addi %0, %c0_i32 : i32
    %c0_1 = arith.constant 0 : index
    %5 = arith.index_cast %4 : i32 to index
    %c0_2 = arith.constant 0 : index
    %c0_3 = arith.constant 0 : index
    %6 = vector.load %arg2[%c0_1, %5, %c0_2, %c0_3] : memref<1x10x10x32xbf16, #tpu.memory_space<vmem>>, vector<1x8x8x32xbf16>
    %7 = vector.shape_cast %6 : vector<1x8x8x32xbf16> to vector<8x8x32xbf16>
    %c0_4 = arith.constant 0 : index
    %c0_5 = arith.constant 0 : index
    %c0_6 = arith.constant 0 : index
    %8 = vector.load %arg4[%c0_4, %c0_5, %c0_6] : memref<9x32x24xbf16, #tpu.memory_space<vmem>>, vector<1x32x24xbf16>
    %9 = vector.shape_cast %8 : vector<1x32x24xbf16> to vector<32x24xbf16>
    %cst_7 = arith.constant dense<0.000000e+00> : vector<8x8x24xf32>
    %10 = tpu.matmul %7, %9, %cst_7 {dimension_numbers = #tpu.dot_dimension_numbers<[2], [0], [0, 1], [1], [0, 0, 0, 1, 1, 1], [], []>} : vector<8x8x32xbf16>, vector<32x24xbf16>, vector<8x8x24xf32> -> vector<8x8x24xf32>
    %11 = arith.addf %3, %10 : vector<8x8x24xf32>
    %c0_i32_8 = arith.constant 0 : i32
    %12 = arith.addi %0, %c0_i32_8 : i32
    %c0_9 = arith.constant 0 : index
    %13 = arith.index_cast %12 : i32 to index
    %c1 = arith.constant 1 : index
    %c0_10 = arith.constant 0 : index
    %14 = vector.load %arg2[%c0_9, %13, %c1, %c0_10] : memref<1x10x10x32xbf16, #tpu.memory_space<vmem>>, vector<1x8x8x32xbf16>
    %15 = vector.shape_cast %14 : vector<1x8x8x32xbf16> to vector<8x8x32xbf16>
    %c1_11 = arith.constant 1 : index
    %c0_12 = arith.constant 0 : index
    %c0_13 = arith.constant 0 : index
    %16 = vector.load %arg4[%c1_11, %c0_12, %c0_13] : memref<9x32x24xbf16, #tpu.memory_space<vmem>>, vector<1x32x24xbf16>
    %17 = vector.shape_cast %16 : vector<1x32x24xbf16> to vector<32x24xbf16>
    %cst_14 = arith.constant dense<0.000000e+00> : vector<8x8x24xf32>
    %18 = tpu.matmul %15, %17, %cst_14 {dimension_numbers = #tpu.dot_dimension_numbers<[2], [0], [0, 1], [1], [0, 0, 0, 1, 1, 1], [], []>} : vector<8x8x32xbf16>, vector<32x24xbf16>, vector<8x8x24xf32> -> vector<8x8x24xf32>
    %19 = arith.addf %11, %18 : vector<8x8x24xf32>
    %c0_i32_15 = arith.constant 0 : i32
    %20 = arith.addi %0, %c0_i32_15 : i32
    %c0_16 = arith.constant 0 : index
    %21 = arith.index_cast %20 : i32 to index
    %c2 = arith.constant 2 : index
    %c0_17 = arith.constant 0 : index
    %22 = vector.load %arg2[%c0_16, %21, %c2, %c0_17] : memref<1x10x10x32xbf16, #tpu.memory_space<vmem>>, vector<1x8x8x32xbf16>
    %23 = vector.shape_cast %22 : vector<1x8x8x32xbf16> to vector<8x8x32xbf16>
    %c2_18 = arith.constant 2 : index
    %c0_19 = arith.constant 0 : index
    %c0_20 = arith.constant 0 : index
    %24 = vector.load %arg4[%c2_18, %c0_19, %c0_20] : memref<9x32x24xbf16, #tpu.memory_space<vmem>>, vector<1x32x24xbf16>
    %25 = vector.shape_cast %24 : vector<1x32x24xbf16> to vector<32x24xbf16>
    %cst_21 = arith.constant dense<0.000000e+00> : vector<8x8x24xf32>
    %26 = tpu.matmul %23, %25, %cst_21 {dimension_numbers = #tpu.dot_dimension_numbers<[2], [0], [0, 1], [1], [0, 0, 0, 1, 1, 1], [], []>} : vector<8x8x32xbf16>, vector<32x24xbf16>, vector<8x8x24xf32> -> vector<8x8x24xf32>
    %27 = arith.addf %19, %26 : vector<8x8x24xf32>
    %c1_i32 = arith.constant 1 : i32
    %28 = arith.addi %0, %c1_i32 : i32
    %c0_22 = arith.constant 0 : index
    %29 = arith.index_cast %28 : i32 to index
    %c0_23 = arith.constant 0 : index
    %c0_24 = arith.constant 0 : index
    %30 = vector.load %arg2[%c0_22, %29, %c0_23, %c0_24] : memref<1x10x10x32xbf16, #tpu.memory_space<vmem>>, vector<1x8x8x32xbf16>
    %31 = vector.shape_cast %30 : vector<1x8x8x32xbf16> to vector<8x8x32xbf16>
    %c3 = arith.constant 3 : index
    %c0_25 = arith.constant 0 : index
    %c0_26 = arith.constant 0 : index
    %32 = vector.load %arg4[%c3, %c0_25, %c0_26] : memref<9x32x24xbf16, #tpu.memory_space<vmem>>, vector<1x32x24xbf16>
    %33 = vector.shape_cast %32 : vector<1x32x24xbf16> to vector<32x24xbf16>
    %cst_27 = arith.constant dense<0.000000e+00> : vector<8x8x24xf32>
    %34 = tpu.matmul %31, %33, %cst_27 {dimension_numbers = #tpu.dot_dimension_numbers<[2], [0], [0, 1], [1], [0, 0, 0, 1, 1, 1], [], []>} : vector<8x8x32xbf16>, vector<32x24xbf16>, vector<8x8x24xf32> -> vector<8x8x24xf32>
    %35 = arith.addf %27, %34 : vector<8x8x24xf32>
    %c1_i32_28 = arith.constant 1 : i32
    %36 = arith.addi %0, %c1_i32_28 : i32
    %c0_29 = arith.constant 0 : index
    %37 = arith.index_cast %36 : i32 to index
    %c1_30 = arith.constant 1 : index
    %c0_31 = arith.constant 0 : index
    %38 = vector.load %arg2[%c0_29, %37, %c1_30, %c0_31] : memref<1x10x10x32xbf16, #tpu.memory_space<vmem>>, vector<1x8x8x32xbf16>
    %39 = vector.shape_cast %38 : vector<1x8x8x32xbf16> to vector<8x8x32xbf16>
    %c4 = arith.constant 4 : index
    %c0_32 = arith.constant 0 : index
    %c0_33 = arith.constant 0 : index
    %40 = vector.load %arg4[%c4, %c0_32, %c0_33] : memref<9x32x24xbf16, #tpu.memory_space<vmem>>, vector<1x32x24xbf16>
    %41 = vector.shape_cast %40 : vector<1x32x24xbf16> to vector<32x24xbf16>
    %cst_34 = arith.constant dense<0.000000e+00> : vector<8x8x24xf32>
    %42 = tpu.matmul %39, %41, %cst_34 {dimension_numbers = #tpu.dot_dimension_numbers<[2], [0], [0, 1], [1], [0, 0, 0, 1, 1, 1], [], []>} : vector<8x8x32xbf16>, vector<32x24xbf16>, vector<8x8x24xf32> -> vector<8x8x24xf32>
    %43 = arith.addf %35, %42 : vector<8x8x24xf32>
    %c1_i32_35 = arith.constant 1 : i32
    %44 = arith.addi %0, %c1_i32_35 : i32
    %c0_36 = arith.constant 0 : index
    %45 = arith.index_cast %44 : i32 to index
    %c2_37 = arith.constant 2 : index
    %c0_38 = arith.constant 0 : index
    %46 = vector.load %arg2[%c0_36, %45, %c2_37, %c0_38] : memref<1x10x10x32xbf16, #tpu.memory_space<vmem>>, vector<1x8x8x32xbf16>
    %47 = vector.shape_cast %46 : vector<1x8x8x32xbf16> to vector<8x8x32xbf16>
    %c5 = arith.constant 5 : index
    %c0_39 = arith.constant 0 : index
    %c0_40 = arith.constant 0 : index
    %48 = vector.load %arg4[%c5, %c0_39, %c0_40] : memref<9x32x24xbf16, #tpu.memory_space<vmem>>, vector<1x32x24xbf16>
    %49 = vector.shape_cast %48 : vector<1x32x24xbf16> to vector<32x24xbf16>
    %cst_41 = arith.constant dense<0.000000e+00> : vector<8x8x24xf32>
    %50 = tpu.matmul %47, %49, %cst_41 {dimension_numbers = #tpu.dot_dimension_numbers<[2], [0], [0, 1], [1], [0, 0, 0, 1, 1, 1], [], []>} : vector<8x8x32xbf16>, vector<32x24xbf16>, vector<8x8x24xf32> -> vector<8x8x24xf32>
    %51 = arith.addf %43, %50 : vector<8x8x24xf32>
    %c2_i32 = arith.constant 2 : i32
    %52 = arith.addi %0, %c2_i32 : i32
    %c0_42 = arith.constant 0 : index
    %53 = arith.index_cast %52 : i32 to index
    %c0_43 = arith.constant 0 : index
    %c0_44 = arith.constant 0 : index
    %54 = vector.load %arg2[%c0_42, %53, %c0_43, %c0_44] : memref<1x10x10x32xbf16, #tpu.memory_space<vmem>>, vector<1x8x8x32xbf16>
    %55 = vector.shape_cast %54 : vector<1x8x8x32xbf16> to vector<8x8x32xbf16>
    %c6 = arith.constant 6 : index
    %c0_45 = arith.constant 0 : index
    %c0_46 = arith.constant 0 : index
    %56 = vector.load %arg4[%c6, %c0_45, %c0_46] : memref<9x32x24xbf16, #tpu.memory_space<vmem>>, vector<1x32x24xbf16>
    %57 = vector.shape_cast %56 : vector<1x32x24xbf16> to vector<32x24xbf16>
    %cst_47 = arith.constant dense<0.000000e+00> : vector<8x8x24xf32>
    %58 = tpu.matmul %55, %57, %cst_47 {dimension_numbers = #tpu.dot_dimension_numbers<[2], [0], [0, 1], [1], [0, 0, 0, 1, 1, 1], [], []>} : vector<8x8x32xbf16>, vector<32x24xbf16>, vector<8x8x24xf32> -> vector<8x8x24xf32>
    %59 = arith.addf %51, %58 : vector<8x8x24xf32>
    %c2_i32_48 = arith.constant 2 : i32
    %60 = arith.addi %0, %c2_i32_48 : i32
    %c0_49 = arith.constant 0 : index
    %61 = arith.index_cast %60 : i32 to index
    %c1_50 = arith.constant 1 : index
    %c0_51 = arith.constant 0 : index
    %62 = vector.load %arg2[%c0_49, %61, %c1_50, %c0_51] : memref<1x10x10x32xbf16, #tpu.memory_space<vmem>>, vector<1x8x8x32xbf16>
    %63 = vector.shape_cast %62 : vector<1x8x8x32xbf16> to vector<8x8x32xbf16>
    %c7 = arith.constant 7 : index
    %c0_52 = arith.constant 0 : index
    %c0_53 = arith.constant 0 : index
    %64 = vector.load %arg4[%c7, %c0_52, %c0_53] : memref<9x32x24xbf16, #tpu.memory_space<vmem>>, vector<1x32x24xbf16>
    %65 = vector.shape_cast %64 : vector<1x32x24xbf16> to vector<32x24xbf16>
    %cst_54 = arith.constant dense<0.000000e+00> : vector<8x8x24xf32>
    %66 = tpu.matmul %63, %65, %cst_54 {dimension_numbers = #tpu.dot_dimension_numbers<[2], [0], [0, 1], [1], [0, 0, 0, 1, 1, 1], [], []>} : vector<8x8x32xbf16>, vector<32x24xbf16>, vector<8x8x24xf32> -> vector<8x8x24xf32>
    %67 = arith.addf %59, %66 : vector<8x8x24xf32>
    %c2_i32_55 = arith.constant 2 : i32
    %68 = arith.addi %0, %c2_i32_55 : i32
    %c0_56 = arith.constant 0 : index
    %69 = arith.index_cast %68 : i32 to index
    %c2_57 = arith.constant 2 : index
    %c0_58 = arith.constant 0 : index
    %70 = vector.load %arg2[%c0_56, %69, %c2_57, %c0_58] : memref<1x10x10x32xbf16, #tpu.memory_space<vmem>>, vector<1x8x8x32xbf16>
    %71 = vector.shape_cast %70 : vector<1x8x8x32xbf16> to vector<8x8x32xbf16>
    %c8 = arith.constant 8 : index
    %c0_59 = arith.constant 0 : index
    %c0_60 = arith.constant 0 : index
    %72 = vector.load %arg4[%c8, %c0_59, %c0_60] : memref<9x32x24xbf16, #tpu.memory_space<vmem>>, vector<1x32x24xbf16>
    %73 = vector.shape_cast %72 : vector<1x32x24xbf16> to vector<32x24xbf16>
    %cst_61 = arith.constant dense<0.000000e+00> : vector<8x8x24xf32>
    %74 = tpu.matmul %71, %73, %cst_61 {dimension_numbers = #tpu.dot_dimension_numbers<[2], [0], [0, 1], [1], [0, 0, 0, 1, 1, 1], [], []>} : vector<8x8x32xbf16>, vector<32x24xbf16>, vector<8x8x24xf32> -> vector<8x8x24xf32>
    %75 = arith.addf %67, %74 : vector<8x8x24xf32>
    %c0_i32_62 = arith.constant 0 : i32
    %76 = arith.addi %0, %c0_i32_62 : i32
    %c0_63 = arith.constant 0 : index
    %77 = arith.index_cast %76 : i32 to index
    %c0_64 = arith.constant 0 : index
    %c0_65 = arith.constant 0 : index
    %78 = vector.load %arg3[%c0_63, %77, %c0_64, %c0_65] : memref<1x10x10x16xbf16, #tpu.memory_space<vmem>>, vector<1x8x8x16xbf16>
    %79 = vector.shape_cast %78 : vector<1x8x8x16xbf16> to vector<8x8x16xbf16>
    %c0_66 = arith.constant 0 : index
    %c0_67 = arith.constant 0 : index
    %c0_68 = arith.constant 0 : index
    %80 = vector.load %arg5[%c0_66, %c0_67, %c0_68] : memref<9x16x24xbf16, #tpu.memory_space<vmem>>, vector<1x16x24xbf16>
    %81 = vector.shape_cast %80 : vector<1x16x24xbf16> to vector<16x24xbf16>
    %cst_69 = arith.constant dense<0.000000e+00> : vector<8x8x24xf32>
    %82 = tpu.matmul %79, %81, %cst_69 {dimension_numbers = #tpu.dot_dimension_numbers<[2], [0], [0, 1], [1], [0, 0, 0, 1, 1, 1], [], []>} : vector<8x8x16xbf16>, vector<16x24xbf16>, vector<8x8x24xf32> -> vector<8x8x24xf32>
    %83 = arith.addf %75, %82 : vector<8x8x24xf32>
    %c0_i32_70 = arith.constant 0 : i32
    %84 = arith.addi %0, %c0_i32_70 : i32
    %c0_71 = arith.constant 0 : index
    %85 = arith.index_cast %84 : i32 to index
    %c1_72 = arith.constant 1 : index
    %c0_73 = arith.constant 0 : index
    %86 = vector.load %arg3[%c0_71, %85, %c1_72, %c0_73] : memref<1x10x10x16xbf16, #tpu.memory_space<vmem>>, vector<1x8x8x16xbf16>
    %87 = vector.shape_cast %86 : vector<1x8x8x16xbf16> to vector<8x8x16xbf16>
    %c1_74 = arith.constant 1 : index
    %c0_75 = arith.constant 0 : index
    %c0_76 = arith.constant 0 : index
    %88 = vector.load %arg5[%c1_74, %c0_75, %c0_76] : memref<9x16x24xbf16, #tpu.memory_space<vmem>>, vector<1x16x24xbf16>
    %89 = vector.shape_cast %88 : vector<1x16x24xbf16> to vector<16x24xbf16>
    %cst_77 = arith.constant dense<0.000000e+00> : vector<8x8x24xf32>
    %90 = tpu.matmul %87, %89, %cst_77 {dimension_numbers = #tpu.dot_dimension_numbers<[2], [0], [0, 1], [1], [0, 0, 0, 1, 1, 1], [], []>} : vector<8x8x16xbf16>, vector<16x24xbf16>, vector<8x8x24xf32> -> vector<8x8x24xf32>
    %91 = arith.addf %83, %90 : vector<8x8x24xf32>
    %c0_i32_78 = arith.constant 0 : i32
    %92 = arith.addi %0, %c0_i32_78 : i32
    %c0_79 = arith.constant 0 : index
    %93 = arith.index_cast %92 : i32 to index
    %c2_80 = arith.constant 2 : index
    %c0_81 = arith.constant 0 : index
    %94 = vector.load %arg3[%c0_79, %93, %c2_80, %c0_81] : memref<1x10x10x16xbf16, #tpu.memory_space<vmem>>, vector<1x8x8x16xbf16>
    %95 = vector.shape_cast %94 : vector<1x8x8x16xbf16> to vector<8x8x16xbf16>
    %c2_82 = arith.constant 2 : index
    %c0_83 = arith.constant 0 : index
    %c0_84 = arith.constant 0 : index
    %96 = vector.load %arg5[%c2_82, %c0_83, %c0_84] : memref<9x16x24xbf16, #tpu.memory_space<vmem>>, vector<1x16x24xbf16>
    %97 = vector.shape_cast %96 : vector<1x16x24xbf16> to vector<16x24xbf16>
    %cst_85 = arith.constant dense<0.000000e+00> : vector<8x8x24xf32>
    %98 = tpu.matmul %95, %97, %cst_85 {dimension_numbers = #tpu.dot_dimension_numbers<[2], [0], [0, 1], [1], [0, 0, 0, 1, 1, 1], [], []>} : vector<8x8x16xbf16>, vector<16x24xbf16>, vector<8x8x24xf32> -> vector<8x8x24xf32>
    %99 = arith.addf %91, %98 : vector<8x8x24xf32>
    %c1_i32_86 = arith.constant 1 : i32
    %100 = arith.addi %0, %c1_i32_86 : i32
    %c0_87 = arith.constant 0 : index
    %101 = arith.index_cast %100 : i32 to index
    %c0_88 = arith.constant 0 : index
    %c0_89 = arith.constant 0 : index
    %102 = vector.load %arg3[%c0_87, %101, %c0_88, %c0_89] : memref<1x10x10x16xbf16, #tpu.memory_space<vmem>>, vector<1x8x8x16xbf16>
    %103 = vector.shape_cast %102 : vector<1x8x8x16xbf16> to vector<8x8x16xbf16>
    %c3_90 = arith.constant 3 : index
    %c0_91 = arith.constant 0 : index
    %c0_92 = arith.constant 0 : index
    %104 = vector.load %arg5[%c3_90, %c0_91, %c0_92] : memref<9x16x24xbf16, #tpu.memory_space<vmem>>, vector<1x16x24xbf16>
    %105 = vector.shape_cast %104 : vector<1x16x24xbf16> to vector<16x24xbf16>
    %cst_93 = arith.constant dense<0.000000e+00> : vector<8x8x24xf32>
    %106 = tpu.matmul %103, %105, %cst_93 {dimension_numbers = #tpu.dot_dimension_numbers<[2], [0], [0, 1], [1], [0, 0, 0, 1, 1, 1], [], []>} : vector<8x8x16xbf16>, vector<16x24xbf16>, vector<8x8x24xf32> -> vector<8x8x24xf32>
    %107 = arith.addf %99, %106 : vector<8x8x24xf32>
    %c1_i32_94 = arith.constant 1 : i32
    %108 = arith.addi %0, %c1_i32_94 : i32
    %c0_95 = arith.constant 0 : index
    %109 = arith.index_cast %108 : i32 to index
    %c1_96 = arith.constant 1 : index
    %c0_97 = arith.constant 0 : index
    %110 = vector.load %arg3[%c0_95, %109, %c1_96, %c0_97] : memref<1x10x10x16xbf16, #tpu.memory_space<vmem>>, vector<1x8x8x16xbf16>
    %111 = vector.shape_cast %110 : vector<1x8x8x16xbf16> to vector<8x8x16xbf16>
    %c4_98 = arith.constant 4 : index
    %c0_99 = arith.constant 0 : index
    %c0_100 = arith.constant 0 : index
    %112 = vector.load %arg5[%c4_98, %c0_99, %c0_100] : memref<9x16x24xbf16, #tpu.memory_space<vmem>>, vector<1x16x24xbf16>
    %113 = vector.shape_cast %112 : vector<1x16x24xbf16> to vector<16x24xbf16>
    %cst_101 = arith.constant dense<0.000000e+00> : vector<8x8x24xf32>
    %114 = tpu.matmul %111, %113, %cst_101 {dimension_numbers = #tpu.dot_dimension_numbers<[2], [0], [0, 1], [1], [0, 0, 0, 1, 1, 1], [], []>} : vector<8x8x16xbf16>, vector<16x24xbf16>, vector<8x8x24xf32> -> vector<8x8x24xf32>
    %115 = arith.addf %107, %114 : vector<8x8x24xf32>
    %c1_i32_102 = arith.constant 1 : i32
    %116 = arith.addi %0, %c1_i32_102 : i32
    %c0_103 = arith.constant 0 : index
    %117 = arith.index_cast %116 : i32 to index
    %c2_104 = arith.constant 2 : index
    %c0_105 = arith.constant 0 : index
    %118 = vector.load %arg3[%c0_103, %117, %c2_104, %c0_105] : memref<1x10x10x16xbf16, #tpu.memory_space<vmem>>, vector<1x8x8x16xbf16>
    %119 = vector.shape_cast %118 : vector<1x8x8x16xbf16> to vector<8x8x16xbf16>
    %c5_106 = arith.constant 5 : index
    %c0_107 = arith.constant 0 : index
    %c0_108 = arith.constant 0 : index
    %120 = vector.load %arg5[%c5_106, %c0_107, %c0_108] : memref<9x16x24xbf16, #tpu.memory_space<vmem>>, vector<1x16x24xbf16>
    %121 = vector.shape_cast %120 : vector<1x16x24xbf16> to vector<16x24xbf16>
    %cst_109 = arith.constant dense<0.000000e+00> : vector<8x8x24xf32>
    %122 = tpu.matmul %119, %121, %cst_109 {dimension_numbers = #tpu.dot_dimension_numbers<[2], [0], [0, 1], [1], [0, 0, 0, 1, 1, 1], [], []>} : vector<8x8x16xbf16>, vector<16x24xbf16>, vector<8x8x24xf32> -> vector<8x8x24xf32>
    %123 = arith.addf %115, %122 : vector<8x8x24xf32>
    %c2_i32_110 = arith.constant 2 : i32
    %124 = arith.addi %0, %c2_i32_110 : i32
    %c0_111 = arith.constant 0 : index
    %125 = arith.index_cast %124 : i32 to index
    %c0_112 = arith.constant 0 : index
    %c0_113 = arith.constant 0 : index
    %126 = vector.load %arg3[%c0_111, %125, %c0_112, %c0_113] : memref<1x10x10x16xbf16, #tpu.memory_space<vmem>>, vector<1x8x8x16xbf16>
    %127 = vector.shape_cast %126 : vector<1x8x8x16xbf16> to vector<8x8x16xbf16>
    %c6_114 = arith.constant 6 : index
    %c0_115 = arith.constant 0 : index
    %c0_116 = arith.constant 0 : index
    %128 = vector.load %arg5[%c6_114, %c0_115, %c0_116] : memref<9x16x24xbf16, #tpu.memory_space<vmem>>, vector<1x16x24xbf16>
    %129 = vector.shape_cast %128 : vector<1x16x24xbf16> to vector<16x24xbf16>
    %cst_117 = arith.constant dense<0.000000e+00> : vector<8x8x24xf32>
    %130 = tpu.matmul %127, %129, %cst_117 {dimension_numbers = #tpu.dot_dimension_numbers<[2], [0], [0, 1], [1], [0, 0, 0, 1, 1, 1], [], []>} : vector<8x8x16xbf16>, vector<16x24xbf16>, vector<8x8x24xf32> -> vector<8x8x24xf32>
    %131 = arith.addf %123, %130 : vector<8x8x24xf32>
    %c2_i32_118 = arith.constant 2 : i32
    %132 = arith.addi %0, %c2_i32_118 : i32
    %c0_119 = arith.constant 0 : index
    %133 = arith.index_cast %132 : i32 to index
    %c1_120 = arith.constant 1 : index
    %c0_121 = arith.constant 0 : index
    %134 = vector.load %arg3[%c0_119, %133, %c1_120, %c0_121] : memref<1x10x10x16xbf16, #tpu.memory_space<vmem>>, vector<1x8x8x16xbf16>
    %135 = vector.shape_cast %134 : vector<1x8x8x16xbf16> to vector<8x8x16xbf16>
    %c7_122 = arith.constant 7 : index
    %c0_123 = arith.constant 0 : index
    %c0_124 = arith.constant 0 : index
    %136 = vector.load %arg5[%c7_122, %c0_123, %c0_124] : memref<9x16x24xbf16, #tpu.memory_space<vmem>>, vector<1x16x24xbf16>
    %137 = vector.shape_cast %136 : vector<1x16x24xbf16> to vector<16x24xbf16>
    %cst_125 = arith.constant dense<0.000000e+00> : vector<8x8x24xf32>
    %138 = tpu.matmul %135, %137, %cst_125 {dimension_numbers = #tpu.dot_dimension_numbers<[2], [0], [0, 1], [1], [0, 0, 0, 1, 1, 1], [], []>} : vector<8x8x16xbf16>, vector<16x24xbf16>, vector<8x8x24xf32> -> vector<8x8x24xf32>
    %139 = arith.addf %131, %138 : vector<8x8x24xf32>
    %c2_i32_126 = arith.constant 2 : i32
    %140 = arith.addi %0, %c2_i32_126 : i32
    %c0_127 = arith.constant 0 : index
    %141 = arith.index_cast %140 : i32 to index
    %c2_128 = arith.constant 2 : index
    %c0_129 = arith.constant 0 : index
    %142 = vector.load %arg3[%c0_127, %141, %c2_128, %c0_129] : memref<1x10x10x16xbf16, #tpu.memory_space<vmem>>, vector<1x8x8x16xbf16>
    %143 = vector.shape_cast %142 : vector<1x8x8x16xbf16> to vector<8x8x16xbf16>
    %c8_130 = arith.constant 8 : index
    %c0_131 = arith.constant 0 : index
    %c0_132 = arith.constant 0 : index
    %144 = vector.load %arg5[%c8_130, %c0_131, %c0_132] : memref<9x16x24xbf16, #tpu.memory_space<vmem>>, vector<1x16x24xbf16>
    %145 = vector.shape_cast %144 : vector<1x16x24xbf16> to vector<16x24xbf16>
    %cst_133 = arith.constant dense<0.000000e+00> : vector<8x8x24xf32>
    %146 = tpu.matmul %143, %145, %cst_133 {dimension_numbers = #tpu.dot_dimension_numbers<[2], [0], [0, 1], [1], [0, 0, 0, 1, 1, 1], [], []>} : vector<8x8x16xbf16>, vector<16x24xbf16>, vector<8x8x24xf32> -> vector<8x8x24xf32>
    %147 = arith.addf %139, %146 : vector<8x8x24xf32>
    %148 = vector.broadcast %2 : vector<1x1x24xf32> to vector<8x8x24xf32>
    %149 = arith.addf %147, %148 : vector<8x8x24xf32>
    %cst_134 = arith.constant 0.000000e+00 : f32
    %150 = vector.broadcast %cst_134 : f32 to vector<8x8x24xf32>
    %151 = arith.maximumf %149, %150 : vector<8x8x24xf32>
    %152 = arith.truncf %151 : vector<8x8x24xf32> to vector<8x8x24xbf16>
    %c0_135 = arith.constant 0 : index
    %c0_136 = arith.constant 0 : index
    %c0_137 = arith.constant 0 : index
    %c0_138 = arith.constant 0 : index
    %153 = vector.load %arg7[%c0_135, %c0_136, %c0_137, %c0_138] : memref<1x8x8x24xbf16, #tpu.memory_space<vmem>>, vector<1x8x8x24xbf16>
    %154 = vector.shape_cast %153 : vector<1x8x8x24xbf16> to vector<8x8x24xbf16>
    %155 = vector.shape_cast %152 : vector<8x8x24xbf16> to vector<1x8x8x24xbf16>
    tpu.vector_store %arg7[%c0_135, %c0_136, %c0_137, %c0_138], %155 {strides = array<i32>} : memref<1x8x8x24xbf16, #tpu.memory_space<vmem>>, vector<1x8x8x24xbf16>,
    return
  }
  func.func @transform_0(%arg0: i32, %arg1: i32) -> (i32, i32, i32, i32) {
    %c0_i32 = arith.constant 0 : i32
    %c0_i32_0 = arith.constant 0 : i32
    %c0_i32_1 = arith.constant 0 : i32
    %c0_i32_2 = arith.constant 0 : i32
    return %arg0, %c0_i32, %c0_i32_0, %c0_i32_1 : i32, i32, i32, i32
  }
  func.func @transform_1(%arg0: i32, %arg1: i32) -> (i32, i32, i32, i32) {
    %c0_i32 = arith.constant 0 : i32
    %c0_i32_0 = arith.constant 0 : i32
    %c0_i32_1 = arith.constant 0 : i32
    %c0_i32_2 = arith.constant 0 : i32
    return %arg0, %c0_i32, %c0_i32_0, %c0_i32_1 : i32, i32, i32, i32
  }
  func.func @transform_2(%arg0: i32, %arg1: i32) -> (i32, i32, i32) {
    %c0_i32 = arith.constant 0 : i32
    %c0_i32_0 = arith.constant 0 : i32
    %c0_i32_1 = arith.constant 0 : i32
    %c0_i32_2 = arith.constant 0 : i32
    return %c0_i32, %c0_i32_0, %c0_i32_1 : i32, i32, i32
  }
  func.func @transform_3(%arg0: i32, %arg1: i32) -> (i32, i32, i32) {
    %c0_i32 = arith.constant 0 : i32
    %c0_i32_0 = arith.constant 0 : i32
    %c0_i32_1 = arith.constant 0 : i32
    %c0_i32_2 = arith.constant 0 : i32
    return %c0_i32, %c0_i32_0, %c0_i32_1 : i32, i32, i32
  }
  func.func @transform_4(%arg0: i32, %arg1: i32) -> (i32, i32) {
    %c0_i32 = arith.constant 0 : i32
    %c0_i32_0 = arith.constant 0 : i32
    %c0_i32_1 = arith.constant 0 : i32
    return %c0_i32, %c0_i32_0 : i32, i32
  }
  func.func @transform_5(%arg0: i32, %arg1: i32) -> (i32, i32, i32, i32) {
    %c0_i32 = arith.constant 0 : i32
    %c0_i32_0 = arith.constant 0 : i32
    %c0_i32_1 = arith.constant 0 : i32
    return %arg0, %arg1, %c0_i32, %c0_i32_0 : i32, i32, i32, i32
  }
}

</mosaic_0001>

<bundles_post_ra>
// kernel: tpu_custom_call.1
= control target key start
LH: loop header
LB: loop body
LE: loop exit
PB: predicated region body
PF: predicated region fallthrough
CT: control target
= control target key end

     0   :  { %vm10_vm0 = vcmask 191488   ;;  %vm12_vm1 = vcmask 190464   ;;  %v332_v1 = vmov 0   ;;  %vm197_vm2 = vsmask.f32 7938  ;;  %s499_s0 = inlined_call_operand.vmem [shape: bf16[8,12,24], index: 0, kind: input, shape index: {}]   ;;  %s500_s1 = inlined_call_operand.hbm [shape: bf16[10,14,24], index: 1, kind: output, shape index: {}]  }
   0x1   :  { %v32_v0 = vld [vmem:[%s499_s0] sm:$0xf]  ;;  %14 = vst.msk [vmem:[#allocation2 + $0x8] sm:$0xf] %vm10_vm0, %v332_v1  ;;  %11 = vst.msk [vmem:[#allocation2] sm:$0xf] %vm10_vm0, %v332_v1 }
   0x2   :  { %16 = vst.msk [vmem:[#allocation2 + $0x10] sm:$0xf] %vm10_vm0, %v332_v1  ;;  %18 = vst.msk [vmem:[#allocation2 + $0x18] sm:$0xf] %vm10_vm0, %v332_v1  ;;  %v52_v2 = vshrl.u32 %v32_v0, 16  ;;  %v55_v3 = vshll.u32 %v32_v0, 16 }
   0x3   :  { %20 = vst.msk [vmem:[#allocation2 + $0x20] sm:$0xf] %vm10_vm0, %v332_v1  ;;  %22 = vst.msk [vmem:[#allocation2 + $0x28] sm:$0xf] %vm10_vm0, %v332_v1  ;;  %v33_v4 = vld [vmem:[%s499_s0 + $0x4] sm:$0x3] }
   0x4   :  { %24 = vst.msk [vmem:[#allocation2 + $0x30] sm:$0xf] %vm10_vm0, %v332_v1  ;;  %26 = vst.msk [vmem:[#allocation2 + $0x38] sm:$0xf] %vm10_vm0, %v332_v1  ;;  %vm48_vm3 = vsmask.f32 256 }
   0x5   :  { %28 = vst.msk [vmem:[#allocation2 + $0x40] sm:$0xf] %vm10_vm0, %v332_v1  ;;  %30 = vst.msk [vmem:[#allocation2 + $0x48] sm:$0xf] %vm10_vm0, %v332_v1  ;;  %vm49_vm4 = vsmask.f32 4368 }
   0x6   :  { %15 = vst.msk [vmem:[#allocation2 + $0xc] sm:$0x7] %vm12_vm1, %v332_v1  ;;  %13 = vst.msk [vmem:[#allocation2 + $0x4] sm:$0x7] %vm12_vm1, %v332_v1  ;;  %v60_v5 = vshrl.u32 %v33_v4, 16  ;;  %v63_v6 = vshll.u32 %v33_v4, 16 }
   0x7   :  { %17 = vst.msk [vmem:[#allocation2 + $0x14] sm:$0x7] %vm12_vm1, %v332_v1  ;;  %19 = vst.msk [vmem:[#allocation2 + $0x1c] sm:$0x7] %vm12_vm1, %v332_v1  ;;  %v54_v7 = vrot.slane %v52_v2, 7 }
   0x8   :  { %21 = vst.msk [vmem:[#allocation2 + $0x24] sm:$0x7] %vm12_vm1, %v332_v1  ;;  %23 = vst.msk [vmem:[#allocation2 + $0x2c] sm:$0x7] %vm12_vm1, %v332_v1  ;;  %vm203_vm5 = vsmask.f32 2304 }
   0x9   :  { %25 = vst.msk [vmem:[#allocation2 + $0x34] sm:$0x7] %vm12_vm1, %v332_v1  ;;  %27 = vst.msk [vmem:[#allocation2 + $0x3c] sm:$0x7] %vm12_vm1, %v332_v1  ;;  %v34_v8 = vld [vmem:[%s499_s0 + $0x8] sm:$0xf]  ;;  %v57_v14 = vor.u32 %v55_v3, %v54_v7 }
   0xa   :  { %29 = vst.msk [vmem:[#allocation2 + $0x44] sm:$0x7] %vm12_vm1, %v332_v1  ;;  %31 = vst.msk [vmem:[#allocation2 + $0x4c] sm:$0x7] %vm12_vm1, %v332_v1  ;;  %v62_v10 = vrot.slane %v60_v5, 7  ;;  %v68_v11 = vshrl.u32 %v34_v8, 16 }
   0xb   :  { %vm376_vm6 = vmand %vm10_vm0, %vm197_vm2  ;;  %v71_v12 = vshll.u32 %v34_v8, 16  ;;  %v35_v13 = vld [vmem:[%s499_s0 + $0xc] sm:$0x3]  ;;  %v58_v16 = vrot.slane %v54_v7, 4  ;;  %v36_v19 = vld [vmem:[%s499_s0 + $0x10] sm:$0xf] }
   0xc   :  { %vm383_vm7 = vmor %vm48_vm3, %vm49_vm4  ;;  %v76_v17 = vshrl.u32 %v35_v13, 16  ;;  %v79_v18 = vshll.u32 %v35_v13, 16  ;;  %v65_v20 = vor.u32 %v63_v6, %v62_v10  ;;  %v70_v22 = vrot.slane %v68_v11, 7  ;;  %v37_v24 = vld [vmem:[%s499_s0 + $0x14] sm:$0x3] }
   0xd   :  { %vm391_vm8 = vmand %vm12_vm1, %vm203_vm5  ;;  %v84_v23 = vshrl.u32 %v36_v19, 16  ;;  %v87_v26 = vshll.u32 %v36_v19, 16  ;;  %v92_v27 = vshrl.u32 %v37_v24, 16  ;;  %v95_v28 = vshll.u32 %v37_v24, 16  ;;  %v38_v29 = vld [vmem:[%s499_s0 + $0x18] sm:$0xf] }
   0xe   :  { %v78_v25 = vrot.slane %v76_v17, 7  ;;  %v199_v30 = vld [vmem:[#allocation2 + $0x8] sm:$0xf]  ;;  %v66_v31 = vsel %vm383_vm7, %v58_v16, %v65_v20  ;;  %v205_v32 = vld [vmem:[#allocation2 + $0xc] sm:$0x7]  ;;  %v73_v33 = vor.u32 %v71_v12, %v70_v22  ;;  %v74_v37 = vrot.slane %v70_v22, 4 }
   0xf   :  { %v208_v34 = vld [vmem:[#allocation2 + $0x10] sm:$0xf]  ;;  %v200_v35 = vsel %vm376_vm6, %v57_v14, %v199_v30  ;;  %v206_v36 = vsel %vm391_vm8, %v66_v31, %v205_v32  ;;  %v211_v39 = vld [vmem:[#allocation2 + $0x14] sm:$0x7]  ;;  %v86_v41 = vrot.slane %v84_v23, 7  ;;  %v94_v42 = vrot.slane %v92_v27, 7 }
  0x10   :  { %v81_v38 = vor.u32 %v79_v18, %v78_v25  ;;  %201 = vst [vmem:[#allocation2 + $0x8] sm:$0xf] %v200_v35  ;;  %207 = vst [vmem:[#allocation2 + $0xc] sm:$0x7] %v206_v36  ;;  %v209_v40 = vsel %vm376_vm6, %v73_v33, %v208_v34  ;;  %v100_v43 = vshrl.u32 %v38_v29, 16  ;;  %v103_v46 = vshll.u32 %v38_v29, 16 }
  0x11   :  { %210 = vst [vmem:[#allocation2 + $0x10] sm:$0xf] %v209_v40  ;;  %v214_v45 = vld [vmem:[#allocation2 + $0x18] sm:$0xf]  ;;  %v39_v47 = vld [vmem:[%s499_s0 + $0x1c] sm:$0x3]  ;;  %v89_v49 = vor.u32 %v87_v26, %v86_v41  ;;  %v97_v51 = vor.u32 %v95_v28, %v94_v42 }
  0x12   :  { %v82_v44 = vsel %vm383_vm7, %v74_v37, %v81_v38  ;;  %v90_v50 = vrot.slane %v86_v41, 4  ;;  %v217_v52 = vld [vmem:[#allocation2 + $0x1c] sm:$0x7]  ;;  %v40_v53 = vld [vmem:[%s499_s0 + $0x20] sm:$0xf]  ;;  %v102_v54 = vrot.slane %v100_v43, 7 }
  0x13   :  { %v212_v48 = vsel %vm391_vm8, %v82_v44, %v211_v39  ;;  %v108_v55 = vshrl.u32 %v39_v47, 16  ;;  %v111_v56 = vshll.u32 %v39_v47, 16  ;;  %v116_v57 = vshrl.u32 %v40_v53, 16  ;;  %v220_v60 = vld [vmem:[#allocation2 + $0x20] sm:$0xf] }
  0x14   :  { %213 = vst [vmem:[#allocation2 + $0x14] sm:$0x7] %v212_v48  ;;  %v215_v58 = vsel %vm376_vm6, %v89_v49, %v214_v45  ;;  %v98_v59 = vsel %vm383_vm7, %v90_v50, %v97_v51  ;;  %v119_v61 = vshll.u32 %v40_v53, 16  ;;  %v41_v62 = vld [vmem:[%s499_s0 + $0x24] sm:$0x3]  ;;  %v105_v0 = vor.u32 %v103_v46, %v102_v54 }
  0x15   :  { %216 = vst [vmem:[#allocation2 + $0x18] sm:$0xf] %v215_v58  ;;  %v218_v63 = vsel %vm391_vm8, %v98_v59, %v217_v52  ;;  %v106_v1 = vrot.slane %v102_v54, 4  ;;  %v110_v2 = vrot.slane %v108_v55, 7  ;;  %v223_v3 = vld [vmem:[#allocation2 + $0x24] sm:$0x7] }
  0x16   :  { %v42_v4 = vld [vmem:[%s499_s0 + $0x28] sm:$0xf]  ;;  %219 = vst [vmem:[#allocation2 + $0x1c] sm:$0x7] %v218_v63  ;;  %v118_v5 = vrot.slane %v116_v57, 7  ;;  %v124_v6 = vshrl.u32 %v41_v62, 16  ;;  %v221_v11 = vsel %vm376_vm6, %v105_v0, %v220_v60 }
  0x17   :  { %v127_v7 = vshll.u32 %v41_v62, 16  ;;  %v132_v8 = vshrl.u32 %v42_v4, 16  ;;  %v43_v10 = vld [vmem:[%s499_s0 + $0x2c] sm:$0x3]  ;;  %v113_v12 = vor.u32 %v111_v56, %v110_v2  ;;  %v226_v13 = vld [vmem:[#allocation2 + $0x28] sm:$0xf] }
  0x18   :  { %v135_v14 = vshll.u32 %v42_v4, 16  ;;  %v140_v16 = vshrl.u32 %v43_v10, 16  ;;  %v44_v17 = vld [vmem:[%s499_s0 + $0x30] sm:$0xf]  ;;  %222 = vst [vmem:[#allocation2 + $0x20] sm:$0xf] %v221_v11  ;;  %v121_v18 = vor.u32 %v119_v61, %v118_v5 }
  0x19   :  { %v122_v19 = vrot.slane %v118_v5, 4  ;;  %v126_v20 = vrot.slane %v124_v6, 7  ;;  %v134_v22 = vrot.slane %v132_v8, 7  ;;  %v232_v23 = vld [vmem:[#allocation2 + $0x30] sm:$0xf]  ;;  %v114_v24 = vsel %vm383_vm7, %v106_v1, %v113_v12 }
  0x1a   :  { %v142_v25 = vrot.slane %v140_v16, 7  ;;  %v143_v26 = vshll.u32 %v43_v10, 16  ;;  %v148_v27 = vshrl.u32 %v44_v17, 16  ;;  %v45_v28 = vld [vmem:[%s499_s0 + $0x34] sm:$0x3]  ;;  %v224_v29 = vsel %vm391_vm8, %v114_v24, %v223_v3 }
  0x1b   :  { %v227_v30 = vsel %vm376_vm6, %v121_v18, %v226_v13  ;;  %v129_v31 = vor.u32 %v127_v7, %v126_v20  ;;  %v229_v32 = vld [vmem:[#allocation2 + $0x2c] sm:$0x7]  ;;  %v137_v33 = vor.u32 %v135_v14, %v134_v22  ;;  %v235_v34 = vld [vmem:[#allocation2 + $0x34] sm:$0x7]  ;;  %v238_v35 = vld [vmem:[#allocation2 + $0x38] sm:$0xf] }
  0x1c   :  { %225 = vst [vmem:[#allocation2 + $0x24] sm:$0x7] %v224_v29  ;;  %228 = vst [vmem:[#allocation2 + $0x28] sm:$0xf] %v227_v30  ;;  %v138_v36 = vrot.slane %v134_v22, 4  ;;  %v145_v37 = vor.u32 %v143_v26, %v142_v25  ;;  %v150_v38 = vrot.slane %v148_v27, 7 }
  0x1d   :  { %v151_v39 = vshll.u32 %v44_v17, 16  ;;  %v46_v40 = vld [vmem:[%s499_s0 + $0x38] sm:$0xf]  ;;  %v130_v41 = vsel %vm383_vm7, %v122_v19, %v129_v31  ;;  %v233_v42 = vsel %vm376_vm6, %v137_v33, %v232_v23  ;;  %v156_v43 = vshrl.u32 %v45_v28, 16  ;;  %v47_v45 = vld [vmem:[%s499_s0 + $0x3c] sm:$0x3] }
  0x1e   :  { %v159_v44 = vshll.u32 %v45_v28, 16  ;;  %v250_v46 = vld [vmem:[#allocation2] sm:$0xf]  ;;  %v230_v47 = vsel %vm391_vm8, %v130_v41, %v229_v32  ;;  %234 = vst [vmem:[#allocation2 + $0x30] sm:$0xf] %v233_v42  ;;  %v146_v48 = vsel %vm383_vm7, %v138_v36, %v145_v37  ;;  %v154_v50 = vrot.slane %v150_v38, 4 }
  0x1f   :  { %v153_v49 = vor.u32 %v151_v39, %v150_v38  ;;  %270 = vst.msk [vmem:[#allocation3] sm:$0xf] %vm10_vm0, %v250_v46  ;;  %v251_v51 = vld [vmem:[#allocation2 + $0x4] sm:$0x7]  ;;  %v252_v52 = vld [vmem:[#allocation2 + $0x8] sm:$0xf]  ;;  %v236_v53 = vsel %vm391_vm8, %v146_v48, %v235_v34 }
  0x20   :  { %231 = vst [vmem:[#allocation2 + $0x2c] sm:$0x7] %v230_v47  ;;  %v158_v54 = vrot.slane %v156_v43, 7  ;;  %v241_v55 = vld [vmem:[#allocation2 + $0x3c] sm:$0x7]  ;;  %v164_v56 = vshrl.u32 %v46_v40, 16 }
  0x21   :  { %v167_v57 = vshll.u32 %v46_v40, 16  ;;  %271 = vst.msk [vmem:[#allocation3 + $0x4] sm:$0x7] %vm12_vm1, %v251_v51  ;;  %v253_v58 = vld [vmem:[#allocation2 + $0xc] sm:$0x7]  ;;  %v239_v59 = vsel %vm376_vm6, %v153_v49, %v238_v35  ;;  %v172_v61 = vshrl.u32 %v47_v45, 16 }
  0x22   :  { %272 = vst.msk [vmem:[#allocation3 + $0x8] sm:$0xf] %vm10_vm0, %v252_v52  ;;  %237 = vst [vmem:[#allocation2 + $0x34] sm:$0x7] %v236_v53  ;;  %v244_v60 = vld [vmem:[#allocation2 + $0x40] sm:$0xf]  ;;  %v161_v1 = vor.u32 %v159_v44, %v158_v54 }
  0x23   :  { %v175_v62 = vshll.u32 %v47_v45, 16  ;;  %273 = vst.msk [vmem:[#allocation3 + $0xc] sm:$0x7] %vm12_vm1, %v253_v58  ;;  %v254_v63 = vld [vmem:[#allocation2 + $0x10] sm:$0xf]  ;;  %v166_v2 = vrot.slane %v164_v56, 7 }
  0x24   :  { %v255_v0 = vld [vmem:[#allocation2 + $0x14] sm:$0x7]  ;;  %240 = vst [vmem:[#allocation2 + $0x38] sm:$0xf] %v239_v59  ;;  %274 = vst.msk [vmem:[#allocation3 + $0x10] sm:$0xf] %vm10_vm0, %v254_v63  ;;  %v162_v8 = vsel %vm383_vm7, %v154_v50, %v161_v1 }
  0x25   :  { %275 = vst.msk [vmem:[#allocation3 + $0x14] sm:$0x7] %vm12_vm1, %v255_v0  ;;  %v256_v3 = vld [vmem:[#allocation2 + $0x18] sm:$0xf]  ;;  %v257_v4 = vld [vmem:[#allocation2 + $0x1c] sm:$0x7]  ;;  %v169_v10 = vor.u32 %v167_v57, %v166_v2  ;;  %v242_v14 = vsel %vm391_vm8, %v162_v8, %v241_v55 }
  0x26   :  { %v174_v5 = vrot.slane %v172_v61, 7  ;;  %276 = vst.msk [vmem:[#allocation3 + $0x18] sm:$0xf] %vm10_vm0, %v256_v3  ;;  %v258_v6 = vld [vmem:[#allocation2 + $0x20] sm:$0xf]  ;;  %v170_v11 = vrot.slane %v166_v2, 4 }
  0x27   :  { %277 = vst.msk [vmem:[#allocation3 + $0x1c] sm:$0x7] %vm12_vm1, %v257_v4  ;;  %v268_v7 = vld [vmem:[#allocation2 + $0x48] sm:$0xf]  ;;  %v259_v12 = vld [vmem:[#allocation2 + $0x24] sm:$0x7] }
  0x28   :  { %278 = vst.msk [vmem:[#allocation3 + $0x20] sm:$0xf] %vm10_vm0, %v258_v6  ;;  %v260_v13 = vld [vmem:[#allocation2 + $0x28] sm:$0xf]  ;;  %288 = vst.msk [vmem:[#allocation3 + $0x48] sm:$0xf] %vm10_vm0, %v268_v7  ;;  %v177_v16 = vor.u32 %v175_v62, %v174_v5 }
  0x29   :  { %v247_v17 = vld [vmem:[#allocation2 + $0x44] sm:$0x7]  ;;  %279 = vst.msk [vmem:[#allocation3 + $0x24] sm:$0x7] %vm12_vm1, %v259_v12  ;;  %v269_v18 = vld [vmem:[#allocation2 + $0x4c] sm:$0x7] }
  0x2a   :  { %280 = vst.msk [vmem:[#allocation3 + $0x28] sm:$0xf] %vm10_vm0, %v260_v13 }
  0x2b   :  { %6 = vsyncpa [#allocation4], 0  ;;  %243 = vst [vmem:[#allocation2 + $0x3c] sm:$0x7] %v242_v14  ;;  %v245_v19 = vsel %vm376_vm6, %v169_v10, %v244_v60  ;;  %v262_v20 = vld [vmem:[#allocation2 + $0x30] sm:$0xf]  ;;  %v178_v22 = vsel %vm383_vm7, %v170_v11, %v177_v16 }
  0x2c   :  { %289 = vst.msk [vmem:[#allocation3 + $0x4c] sm:$0x7] %vm12_vm1, %v269_v18  ;;  %246 = vst [vmem:[#allocation2 + $0x40] sm:$0xf] %v245_v19  ;;  %v261_v23 = vld [vmem:[#allocation2 + $0x2c] sm:$0x7]  ;;  %v248_v24 = vsel %vm391_vm8, %v178_v22, %v247_v17 }
  0x2d   :  { %282 = vst.msk [vmem:[#allocation3 + $0x30] sm:$0xf] %vm10_vm0, %v262_v20  ;;  %v263_v25 = vld [vmem:[#allocation2 + $0x34] sm:$0x7]  ;;  %249 = vst [vmem:[#allocation2 + $0x44] sm:$0x7] %v248_v24 }
  0x2e   :  { %281 = vst.msk [vmem:[#allocation3 + $0x2c] sm:$0x7] %vm12_vm1, %v261_v23  ;;  %283 = vst.msk [vmem:[#allocation3 + $0x34] sm:$0x7] %vm12_vm1, %v263_v25  ;;  %v264_v9 = vld [vmem:[#allocation2 + $0x38] sm:$0xf] }
  0x2f   :  { %284 = vst.msk [vmem:[#allocation3 + $0x38] sm:$0xf] %vm10_vm0, %v264_v9  ;;  %s333_s0 = smov [#allocation3]  }
  0x30   :  { %s295_s9 = sshll.u32 %s333_s0, 4  ;;  %s296_s9 = int_to_ptr.vmem [resolvable:$true] %s295_s9 }
  0x31   :  { %s310_s10 = scalar_lea.vmem %s296_s9, 1280  ;;  %p315_p1 = scmp.lt.s32.totalorder %s296_s9, %s296_s9 }
  0x32   :  { %v265_v26 = vld [vmem:[#allocation2 + $0x3c] sm:$0x7]  ;;  %p311_p0 = scmp.ne.s32.totalorder %s296_s9, %s310_s10  ;;  %p316_p2 = scmp.lt.s32.totalorder %s310_s10, %s310_s10 }
  0x33   :  { %285 = vst.msk [vmem:[#allocation3 + $0x3c] sm:$0x7] %vm12_vm1, %v265_v26  ;;  %v266_v15 = vld [vmem:[#allocation2 + $0x40] sm:$0xf] }
  0x34   :  { %286 = vst.msk [vmem:[#allocation3 + $0x40] sm:$0xf] %vm10_vm0, %v266_v15  ;;  %v267_v21 = vld [vmem:[#allocation2 + $0x44] sm:$0x7]  ;;  %p317_p3 = por %p316_p2, %p315_p1 }
  0x35   :  { %287 = vst.msk [vmem:[#allocation3 + $0x44] sm:$0x7] %vm12_vm1, %v267_v21 }
  0x36   :  { %p318_p4 = pnand %p317_p3, %p311_p0 }
  0x38   :  { %321 = shalt.err (!%p318_p4)
}
  0x39   :  { %s334_s11 = smov 64   ;;  %s335_s12 = smov 4  }
  0x3a   :  { %301 = dma.vmem_to_hbm [thread:$0]  %s296_s9, 1280, %s500_s1, [#allocation4], %s334_s11, %s334_s11, %s335_s12  }
  0x3b   :  { %330 = dma.done.wait [#allocation4], 1280  }
  0x3c   :  { %331 = vsyncadd [#allocation4], 4294966016 }
  0x3d   :  { %305 = vsyncpa [#allocation4], 1 }

// kernel: tpu_custom_call.1
= control target key start
LH: loop header
LB: loop body
LE: loop exit
PB: predicated region body
PF: predicated region fallthrough
CT: control target
= control target key end

     0   :  { %10 = vsyncpa [#allocation3], 0  ;;  %s5574_s0 = inlined_call_operand.vmem [shape: bf16[2,10,10,32], index: 0, kind: input, shape index: {}]   ;;  %s5575_s1 = inlined_call_operand.vmem [shape: bf16[2,10,10,16], index: 1, kind: input, shape index: {}]   ;;  %s5576_s2 = inlined_call_operand.vmem [shape: bf16[9,32,24], index: 2, kind: input, shape index: {}]   ;;  %s5577_s3 = inlined_call_operand.vmem [shape: bf16[9,16,24], index: 3, kind: input, shape index: {}]   ;;  %s5578_s4 = inlined_call_operand.vmem [shape: f32[1,24], index: 4, kind: input, shape index: {}]   ;;  %s5579_s5 = inlined_call_operand.hbm [shape: bf16[2,8,8,24], index: 5, kind: output, shape index: {}]  }
   0x1   :  { %12 = vsyncpa [#allocation3 + $0x1], 0  ;;  %s4527_s18 = smov 0   ;;  %s4529_s19 = smov 0  }
   0x2   :  { %s4531_s20 = smov 0   ;;  %s4533_s21 = smov 0  }
   0x3   :  { %s4535_s22 = smov 0   ;;  %s4537_s23 = smov 0  }
   0x4 LB: > { %s3600_s24 = sadd.s32 4294967295, %s4492_s23   ;;  %s3601_s25 = sadd.s32 4294967294, %s4492_s23   ;;  %s4492_s23 = sphi %s4537_s23, %s18_s23   ;;  %s4488_s22 = sphi %s4535_s22, %s5602_s22   ;;  %s4484_s21 = sphi %s4533_s21, %s5601_s21   ;;  %s4480_s20 = sphi %s4531_s20, %s5600_s20   ;;  %s4476_s19 = sphi %s4529_s19, %s5599_s19   ;;  %s4472_s18 = sphi %s4527_s18, %s5598_s18  }
   0x5   : > { %s30_s26 = sadd.s32 1, %s4488_s22  ;;  %s154_s27 = sadd.s32 1, %s4480_s20 }
   0x6   : > { %p32_p0 = scmp.ge.s32.totalorder %s30_s26, 2  ;;  %p164_p1 = scmp.ne.s32.totalorder %s4480_s20, %s4476_s19 }
   0x7   : > { %p165_p2 = scmp.eq.s32.totalorder %s3600_s24, 1  ;;  %p170_p3 = scmp.ne.s32.totalorder %s4476_s19, %s4472_s18 }
   0x8   : > { %s5604_s26 = smov (%p32_p0, %s30_s26), 0  ;;  %p171_p5 = scmp.eq.s32.totalorder %s3601_s25, 1 }
   0x9   : > { %p4567_p4 = por %p165_p2, %p164_p1  ;;  %s149_s29 = ssub.s32 %s4488_s22, %s5604_s26 }
   0xa   : > { %p3604_p6 = scmp.ge.s32.totalorder %s4492_s23, 1  ;;  %p152_p7 = scmp.eq.s32.totalorder %s149_s29, 0 }
   0xb   : > { %p4574_p8 = por %p171_p5, %p170_p3  ;;  %p214_p9 = scmp.lt.s32.totalorder %s4492_s23, 3 }
   0xc   : > { %s4580_s6 = scalar_select %p152_p7, %s4480_s20, %s154_s27  }
   0xd   : > { %p215_p10 = pnand %p3604_p6, %p214_p9 }
   0xf   : > { %218 = sbr.rel (%p215_p10) target bundleno = 414 (0x19e), region = 40 }
  0x14   : > { %v4365_v0 = vld [vmem:[%s5576_s2 + $0x8] sm:$0xff]   ;;  %p247_p11 = scmp.lt.s32.totalorder %s4484_s21, 1  ;;  %v4366_v1 = vld [vmem:[%s5576_s2 + $0x18] sm:$0xff]   ;;  %v4367_v2 = vld [vmem:[%s5576_s2] sm:$0xff]   ;;  %vm289_vm0 = vsmask.f32 3328 }
  0x15   : > { %4121 = vmatprep.subr.bf16.mxu1 %v4365_v0  ;;  %4109 = vmatprep.subr.bf16.mxu0 %v4366_v1  ;;  %v4368_v3 = vld [vmem:[%s5576_s2 + $0x10] sm:$0xff]   ;;  %vm290_vm1 = vsmask.f32 7440  ;;  %v4602_v4 = vld [vmem:[%s5576_s2 + $0x28] sm:$0xff]   ;;  %vm428_vm2 = vcmask 261120   ;;  %v4372_v5 = vld [vmem:[%s5576_s2 + $0x38] sm:$0xff]  }
  0x16   : > { %s4593_s13 = scalar_select %p247_p11, %s4484_s21, 1  ;;  %4122 = vmatpush3.bf16.msra.mxu1 %v4365_v0  ;;  %4110 = vmatpush3.bf16.msra.mxu0 %v4366_v1  ;;  %v4376_v34 = vld [vmem:[%s5576_s2 + $0x30] sm:$0xff]   ;;  %vm4638_vm3 = vmor %vm289_vm0, %vm290_vm1  ;;  %vm644_vm4 = vcmask 1042432   ;;  %vm645_vm5 = vcmask 1046532   ;;  %v4656_v53 = vld [vmem:[%s5576_s2 + $0x58] sm:$0xff]   ;;  %vm1918_vm7 = vcmask 130048  }
  0x17   : > { %4123 = vmatprep.subr.bf16.mxu1 %v4367_v2  ;;  %4111 = vmatprep.subr.bf16.mxu0 %v4368_v3  ;;  %vm4704_vm6 = vmor %vm644_vm4, %vm645_vm5  ;;  %s244_s17 = sand.u32 1, %s4476_s19   ;;  %vm3470_vm8 = vcmask 191488   ;;  %s4494_s11 = smov [#allocation2]  }
  0x18   : > { %s4307_s16 = smul.u32 80, %s4593_s13  ;;  %s3605_s13 = sshll.u32 %s244_s17, 5 }
  0x19   : > { %s4420_s12 = sshll.u32 %s4494_s11, 4  ;;  %s4421_s12 = int_to_ptr.vmem [resolvable:$false] %s4420_s12 }
  0x1a   : > { %s4609_s29 = scalar_lea.vmem %s5574_s0, %s4307_s16  ;;  %4124 = vmatpush3.bf16.msra.mxu1 %v4367_v2  ;;  %4112 = vmatpush3.bf16.msra.mxu0 %v4368_v3  ;;  %s4947_s25 = scalar_lea.vmem %s5575_s1, %s4307_s16 }
  0x1b   : > { %v264_v6 = vld [vmem:[%s4609_s29] sm:$0xf]  ;;  %v265_v7 = vld [vmem:[%s4609_s29 + $0x8] sm:$0xf]  ;;  %v266_v8 = vld [vmem:[%s4609_s29 + $0x10] sm:$0xf]  ;;  %4145 = vmatprep.subr.bf16.mxu1 %v4372_v5  ;;  %4133 = vmatprep.subr.bf16.mxu0 %v4602_v4 }
  0x1c   : > { %v293_v9 = vshrl.u32 %v264_v6, 16  ;;  %v296_v10 = vshll.u32 %v264_v6, 16  ;;  %v307_v11 = vshrl.u32 %v265_v7, 16  ;;  %v310_v12 = vshll.u32 %v265_v7, 16  ;;  %v267_v13 = vld [vmem:[%s4609_s29 + $0x18] sm:$0xf] }
  0x1d   : > { %v3622_v14 = vcombine.low %v264_v6, %v265_v7  ;;  %v321_v15 = vshrl.u32 %v266_v8, 16  ;;  %v324_v16 = vshll.u32 %v266_v8, 16  ;;  %v335_v17 = vshrl.u32 %v267_v13, 16  ;;  %v4619_v18 = vld [vmem:[%s4609_s29 + $0x4] sm:$0x1]  ;;  %s5488_s16 = scalar_lea.vmem [#allocation2], %s3605_s13 }
  0x1e   : > { %v295_v19 = vrot.slane %v293_v9, 4  ;;  %v298_v20 = vrot.slane %v296_v10, 5  ;;  %v309_v21 = vrot.slane %v307_v11, 4  ;;  %v312_v22 = vrot.slane %v310_v12, 5  ;;  %v4623_v23 = vld [vmem:[%s4609_s29 + $0xc] sm:$0x1] }
  0x1f   : > { %4125 = vmatprep.mubr.msk.bf16.mxu1 %vm428_vm2, %v3622_v14  ;;  %v323_v24 = vrot.slane %v321_v15, 4  ;;  %v326_v25 = vrot.slane %v324_v16, 5  ;;  %v337_v26 = vrot.slane %v335_v17, 4  ;;  %v338_v27 = vshll.u32 %v267_v13, 16  ;;  %v4628_v32 = vld [vmem:[%s4609_s29 + $0x14] sm:$0x1] }
  0x20   : > { %v3623_v28 = vcombine.low %v266_v8, %v267_v13  ;;  %v299_v29 = vor.u32 %v298_v20, %v295_v19  ;;  %v302_v30 = vshll.u32 %v4619_v18, 16  ;;  %v313_v31 = vor.u32 %v312_v22, %v309_v21  ;;  %v4631_v33 = vld [vmem:[%s4609_s29 + $0x1c] sm:$0x1]  ;;  %v268_v43 = vld [vmem:[%s4609_s29 + $0x20] sm:$0xf]  ;;  %s3495_s27 = sshll.u32 %s5488_s16, 4  ;;  %s5521_s27 = int_to_ptr.vmem [resolvable:$true] %s3495_s27 }
  0x21   : > { %v340_v35 = vrot.slane %v338_v27, 5  ;;  %v316_v37 = vshll.u32 %v4623_v23, 16  ;;  %v649_v38 = vrot.slane %v4619_v18, 5  ;;  %v327_v42 = vor.u32 %v326_v25, %v323_v24  ;;  %v269_v48 = vld [vmem:[%s4609_s29 + $0x28] sm:$0xf]  ;;  %v4375_v9 = vld [vmem:[%s5576_s2 + $0x20] sm:$0xff]   ;;  %p4423_p1 = scmp.lt.s32.totalorder %s5521_s27, %s4421_s12 }
  0x22   : > { %4126 = vmatmul.mubr.msk.bf16.vlgmr.msra.gmra.mxu1 %vm428_vm2, %v3623_v28  ;;  %v300_v39 = vrot.slane %v299_v29, 4  ;;  %v304_v40 = vrot.slane %v302_v30, 5  ;;  %v314_v41 = vrot.slane %v313_v31, 4  ;;  %v330_v45 = vshll.u32 %v4628_v32, 16  ;;  %v270_v51 = vld [vmem:[%s4609_s29 + $0x30] sm:$0xf] }
  0x23   : > { %v318_v44 = vrot.slane %v316_v37, 5  ;;  %v341_v46 = vor.u32 %v340_v35, %v337_v26  ;;  %v344_v47 = vshll.u32 %v4631_v33, 16  ;;  %4146 = vmatpush3.bf16.msra.mxu1 %v4372_v5  ;;  %v328_v50 = vrot.slane %v327_v42, 4  ;;  %v271_v52 = vld [vmem:[%s4609_s29 + $0x38] sm:$0xf]  ;;  %v4688_v26 = vld [vmem:[%s5576_s2 + $0x48] sm:$0xff]  }
  0x24   : > { %v305_v49 = vsel %vm4638_vm3, %v300_v39, %v304_v40  ;;  %4147 = vmatprep.subr.bf16.mxu1 %v4376_v34  ;;  %v332_v55 = vrot.slane %v330_v45, 5  ;;  %v4661_v58 = vld [vmem:[%s4609_s29 + $0x24] sm:$0x1]  ;;  %v349_v60 = vshrl.u32 %v268_v43, 16  ;;  %v352_v61 = vshll.u32 %v268_v43, 16  ;;  %s4416_s10 = scalar_lea.vmem %s5521_s27, 512 }
  0x25   : > { %v319_v54 = vsel %vm4638_vm3, %v314_v41, %v318_v44  ;;  %v342_v56 = vrot.slane %v341_v46, 4  ;;  %v346_v57 = vrot.slane %v344_v47, 5  ;;  %v363_v62 = vshrl.u32 %v269_v48, 16  ;;  %v4668_v3 = vld [vmem:[%s4609_s29 + $0x2c] sm:$0x1]  ;;  %p4417_p12 = scmp.ne.s32.totalorder %s5521_s27, %s4416_s10  ;;  %s4422_s14 = scalar_lea.vmem %s4421_s12, 1024 }
  0x26   : > { %v3612_v59 = vcombine.low %v305_v49, %v319_v54  ;;  %v333_v63 = vsel %vm4638_vm3, %v328_v50, %v332_v55  ;;  %v366_v1 = vshll.u32 %v269_v48, 16  ;;  %v3624_v2 = vcombine.low %v268_v43, %v269_v48  ;;  %v4675_v10 = vld [vmem:[%s4609_s29 + $0x34] sm:$0x1]  ;;  %v4678_v11 = vld [vmem:[%s4609_s29 + $0x3c] sm:$0x1]  ;;  %p4424_p2 = scmp.lt.s32.totalorder %s4422_s14, %s4416_s10 }
  0x27   : > { %v347_v0 = vsel %vm4638_vm3, %v342_v56, %v346_v57  ;;  %4148 = vmatpush3.bf16.msra.mxu1 %v4376_v34  ;;  %v351_v6 = vrot.slane %v349_v60, 4  ;;  %v354_v7 = vrot.slane %v352_v61, 5  ;;  %v365_v8 = vrot.slane %v363_v62, 4  ;;  %v4377_v31 = vld [vmem:[%s4609_s29 + $0x8] ss:$8 sps:$4 sm:$0xff]   ;;  %p4418_p13 = pnand %p4417_p12, %p4567_p4 }
  0x28   : > { %4113 = vmatprep.mubr.msk.bf16.mxu0 %vm428_vm2, %v3612_v59  ;;  %v3613_v5 = vcombine.low %v333_v63, %v347_v0  ;;  %4169 = vmatprep.subr.bf16.mxu1 %v4656_v53  ;;  %v368_v12 = vrot.slane %v366_v1, 5  ;;  %v377_v13 = vshrl.u32 %v270_v51, 16  ;;  %v380_v14 = vshll.u32 %v270_v51, 16  ;;  %v4378_v43 = vld [vmem:[%s4609_s29 + $0x18] ss:$8 sps:$4 sm:$0xff]   ;;  %p4425_p3 = por %p4424_p2, %p4423_p1 }
  0x29   : > { %4129 = vmatprep.mubr.msk.bf16.mxu1 %vm428_vm2, %v3624_v2  ;;  %v391_v15 = vshrl.u32 %v271_v52, 16  ;;  %v394_v16 = vshll.u32 %v271_v52, 16  ;;  %v3625_v17 = vcombine.low %v270_v51, %v271_v52  ;;  %v355_v19 = vor.u32 %v354_v7, %v351_v6  ;;  %v615_v48 = vld [vmem:[%s4609_s29] sm:$0xe]  ;;  %v616_v51 = vld [vmem:[%s4609_s29 + $0x8] sm:$0xe]  ;;  %p4419_p0 = pneg %p4418_p13 }
  0x2a   : > { %4114 = vmatmul.mubr.msk.bf16.vlgmr.msra.gmra.mxu0 %vm428_vm2, %v3613_v5  ;;  %v358_v20 = vshll.u32 %v4661_v58, 16  ;;  %v379_v21 = vrot.slane %v377_v13, 4  ;;  %v382_v22 = vrot.slane %v380_v14, 5  ;;  %v369_v25 = vor.u32 %v368_v12, %v365_v8  ;;  %v617_v57 = vld [vmem:[%s4609_s29 + $0x10] sm:$0xe]  ;;  %v4739_v7 = vld [vmem:[%s5576_s2 + $0x78] sm:$0xff]  }
  0x2b   : > { %4134 = vmatpush3.bf16.msra.mxu0 %v4602_v4  ;;  %v393_v24 = vrot.slane %v391_v15, 4  ;;  %v396_v27 = vrot.slane %v394_v16, 5  ;;  %4130 = vmatmul.mubr.msk.bf16.gmra.mxu1 %vm428_vm2, %v3625_v17  ;;  %v356_v28 = vrot.slane %v355_v19, 4  ;;  %v372_v30 = vshll.u32 %v4668_v3, 16  ;;  %v618_v61 = vld [vmem:[%s4609_s29 + $0x18] sm:$0xe]  ;;  %p4426_p5 = pnand %p4425_p3, %p4419_p0 }
  0x2c   : > { %v360_v29 = vrot.slane %v358_v20, 5  ;;  %4135 = vmatprep.subr.bf16.mxu0 %v4375_v9  ;;  %v370_v4 = vrot.slane %v369_v25, 4  ;;  %v383_v34 = vor.u32 %v382_v22, %v379_v21  ;;  %v386_v35 = vshll.u32 %v4675_v10, 16  ;;  %4149 = vmatprep.mubr.msk.bf16.mxu1 %vm428_vm2, %v4377_v31  ;;  %v4381_v2 = vld [vmem:[%s4609_s29 + $0x28] ss:$8 sps:$4 sm:$0xff]  }
  0x2d   : > { %v400_v37 = vshll.u32 %v4678_v11, 16  ;;  %v653_v39 = vrot.slane %v4623_v23, 5  ;;  %v374_v41 = vrot.slane %v372_v30, 5  ;;  %v397_v42 = vor.u32 %v396_v27, %v393_v24  ;;  %v619_v5 = vld [vmem:[%s4609_s29 + $0x20] sm:$0xe] }
  0x2e   : > { %v361_v40 = vsel %vm4638_vm3, %v356_v28, %v360_v29  ;;  %v657_v44 = vrot.slane %v4628_v32, 5  ;;  %v384_v45 = vrot.slane %v383_v34, 4  ;;  %v388_v46 = vrot.slane %v386_v35, 5  ;;  %v621_v14 = vld [vmem:[%s4609_s29 + $0x30] sm:$0xe]  ;;  %v4383_v29 = vld [vmem:[%s5576_s2 + $0x40] sm:$0xff]  }
  0x2f   : > { %v402_v47 = vrot.slane %v400_v37, 5  ;;  %4136 = vmatpush3.bf16.msra.mxu0 %v4375_v9  ;;  %v375_v49 = vsel %vm4638_vm3, %v370_v4, %v374_v41  ;;  %v398_v50 = vrot.slane %v397_v42, 4  ;;  %v3636_v52 = vrot.slane %v615_v48, 9  ;;  %v620_v9 = vld [vmem:[%s4609_s29 + $0x28] sm:$0xe] }
  0x30   : > { %4157 = vmatprep.subr.bf16.mxu0 %v4688_v26  ;;  %v661_v32 = vrot.slane %v4631_v33, 5  ;;  %v3614_v54 = vcombine.low %v361_v40, %v375_v49  ;;  %v389_v55 = vsel %vm4638_vm3, %v384_v45, %v388_v46  ;;  %v3637_v56 = vrot.slane %v616_v51, 9  ;;  %v4384_v33 = vld [vmem:[%s5576_s2 + $0x50] sm:$0xff]   ;;  %v622_v17 = vld [vmem:[%s4609_s29 + $0x38] sm:$0xe] }
  0x31   : > { %v403_v59 = vsel %vm4638_vm3, %v398_v50, %v402_v47  ;;  %v650_v60 = vsel %vm4704_vm6, %v3636_v52, %v649_v38  ;;  %v3638_v62 = vrot.slane %v617_v57, 9  ;;  %v3639_v1 = vrot.slane %v618_v61, 9  ;;  %v3679_v25 = vld [vmem:[%s4609_s29 + $0x14] sm:$0x1]  ;;  %v3706_v27 = vld [vmem:[%s4609_s29 + $0x8] sm:$0xe] }
  0x32   : > { %4117 = vmatprep.mubr.msk.bf16.mxu0 %vm428_vm2, %v3614_v54  ;;  %v3615_v63 = vcombine.low %v389_v55, %v403_v59  ;;  %v654_v0 = vsel %vm4704_vm6, %v3637_v56, %v653_v39  ;;  %v665_v18 = vrot.slane %v4661_v58, 5  ;;  %v669_v6 = vrot.slane %v4668_v3, 5  ;;  %v3707_v28 = vld [vmem:[%s4609_s29 + $0x10] sm:$0xe]  ;;  %v3681_v35 = vld [vmem:[%s4609_s29 + $0x1c] sm:$0x1] }
  0x33   : > { %4150 = vmatmul.mubr.msk.bf16.vlgmr.msra.gmra.mxu1 %vm428_vm2, %v4378_v43  ;;  %v3644_v38 = vcombine.low %v650_v60, %v654_v0  ;;  %v658_v58 = vsel %vm4704_vm6, %v3638_v62, %v657_v44  ;;  %v662_v8 = vsel %vm4704_vm6, %v3639_v1, %v661_v32  ;;  %v3640_v12 = vrot.slane %v619_v5, 9  ;;  %v4774_v39 = vld [vmem:[%s4609_s29 + $0x24] sm:$0x1]  ;;  %v3708_v40 = vld [vmem:[%s4609_s29 + $0x18] sm:$0xe]  ;;  %v4792_v32 = vld [vmem:[%s5576_s2 + $0x68] sm:$0xff]  }
  0x34   : > { %4118 = vmatmul.mubr.msk.bf16.gmra.mxu0 %vm428_vm2, %v3615_v63  ;;  %4170 = vmatpush3.bf16.msra.mxu1 %v4656_v53  ;;  %v4382_v53 = vld [vmem:[%s4609_s29 + $0x38] ss:$8 sps:$4 sm:$0xff]   ;;  %v673_v3 = vrot.slane %v4675_v10, 5  ;;  %v3641_v13 = vrot.slane %v620_v9, 9  ;;  %v677_v15 = vrot.slane %v4678_v11, 5  ;;  %v3642_v19 = vrot.slane %v621_v14, 9 }
  0x35   : > { %4137 = vmatprep.mubr.msk.bf16.mxu0 %vm428_vm2, %v3644_v38  ;;  %4153 = vmatprep.mubr.msk.bf16.mxu1 %vm428_vm2, %v4381_v2  ;;  %v666_v16 = vsel %vm4704_vm6, %v3640_v12, %v665_v18  ;;  %v3645_v20 = vcombine.low %v658_v58, %v662_v8  ;;  %v3643_v22 = vrot.slane %v622_v17, 9  ;;  %v3677_v10 = vld [vmem:[%s4609_s29 + $0xc] sm:$0x1]  ;;  %v3718_v31 = vrot.slane %v3706_v27, 9  ;;  %v3709_v44 = vld [vmem:[%s4609_s29 + $0x20] sm:$0xe] }
  0x36   : > { %4171 = vmatprep.subr.bf16.mxu1 %v4384_v33  ;;  %v670_v21 = vsel %vm4704_vm6, %v3641_v13, %v669_v6  ;;  %v4760_v11 = vsel %vm4704_vm6, %v3642_v19, %v673_v3  ;;  %v1195_v4 = vrot.slane %v3677_v10, 5  ;;  %v3719_v34 = vrot.slane %v3707_v28, 9  ;;  %v3676_v47 = vld [vmem:[%s4609_s29 + $0x8] sm:$0xf]  ;;  %v3678_v50 = vld [vmem:[%s4609_s29 + $0x10] sm:$0xf] }
  0x37   : > { %v3646_v24 = vcombine.low %v666_v16, %v670_v21  ;;  %v678_v30 = vsel %vm4704_vm6, %v3643_v22, %v677_v15  ;;  %v1199_v37 = vrot.slane %v3679_v25, 5  ;;  %v1203_v41 = vrot.slane %v3681_v35, 5  ;;  %v3680_v62 = vld [vmem:[%s4609_s29 + $0x18] sm:$0xf]  ;;  %v3682_v18 = vld [vmem:[%s4609_s29 + $0x20] sm:$0xf] }
  0x38   : > { %4172 = vmatpush3.bf16.msra.mxu1 %v4384_v33  ;;  %v3647_v42 = vcombine.low %v4760_v11, %v678_v30  ;;  %v1196_v43 = vsel %vm4704_vm6, %v3718_v31, %v1195_v4  ;;  %v3720_v45 = vrot.slane %v3708_v40, 9  ;;  %v1207_v46 = vrot.slane %v4774_v39, 5  ;;  %v4388_v58 = vld [vmem:[%s5576_s2 + $0x70] sm:$0xff]   ;;  %v3685_v16 = vld [vmem:[%s4609_s29 + $0x2c] sm:$0x1]  ;;  %v4810_v17 = vld [vmem:[%s5577_s3] sm:$0xff]  }
  0x39   : > { %4193 = vmatprep.subr.bf16.mxu1 %v4739_v7  ;;  %v1200_v48 = vsel %vm4704_vm6, %v3719_v34, %v1199_v37  ;;  %v3721_v49 = vrot.slane %v3709_v44, 9  ;;  %v944_v51 = vshrl.u32 %v3676_v47, 16  ;;  %v947_v52 = vshll.u32 %v3676_v47, 16  ;;  %v3710_v27 = vld [vmem:[%s4609_s29 + $0x28] sm:$0xe] }
  0x3a   : > { %v3726_v54 = vcombine.low %v1196_v43, %v1200_v48  ;;  %v953_v55 = vshll.u32 %v3677_v10, 16  ;;  %v958_v56 = vshrl.u32 %v3678_v50, 16  ;;  %v961_v61 = vshll.u32 %v3678_v50, 16  ;;  %v3687_v10 = vld [vmem:[%s4609_s29 + $0x34] sm:$0x1] }
  0x3b   : > { %4154 = vmatmul.mubr.msk.bf16.gmra.mxu1 %vm428_vm2, %v4382_v53  ;;  %v1208_v57 = vsel %vm4704_vm6, %v3721_v49, %v1207_v46  ;;  %v946_v59 = vrot.slane %v944_v51, 4  ;;  %v949_v60 = vrot.slane %v947_v52, 5  ;;  %v967_v1 = vshll.u32 %v3679_v25, 16  ;;  %v3711_v28 = vld [vmem:[%s4609_s29 + $0x30] sm:$0xe] }
  0x3c   : > { %4138 = vmatmul.mubr.msk.bf16.vlgmr.msra.gmra.mxu0 %vm428_vm2, %v3645_v20  ;;  %4173 = vmatprep.mubr.msk.bf16.mxu1 %vm428_vm2, %v3726_v54  ;;  %v955_v63 = vrot.slane %v953_v55, 5  ;;  %v960_v0 = vrot.slane %v958_v56, 4  ;;  %v963_v2 = vrot.slane %v961_v61, 5  ;;  %v972_v5 = vshrl.u32 %v3680_v62, 16  ;;  %v4824_v40 = vld [vmem:[%s4609_s29 + $0x44] sm:$0x1] }
  0x3d   : > { %4158 = vmatpush3.bf16.msra.mxu0 %v4688_v26  ;;  %4141 = vmatprep.mubr.msk.bf16.mxu0 %vm428_vm2, %v3646_v24  ;;  %v1204_v26 = vsel %vm4704_vm6, %v3720_v45, %v1203_v41  ;;  %v950_v38 = vor.u32 %v949_v60, %v946_v59  ;;  %v975_v6 = vshll.u32 %v3680_v62, 16  ;;  %v969_v8 = vrot.slane %v967_v1, 5  ;;  %v3712_v41 = vld [vmem:[%s4609_s29 + $0x38] sm:$0xe]  ;;  %v3713_v45 = vld [vmem:[%s4609_s29 + $0x40] sm:$0xe] }
  0x3e   : > { %4159 = vmatprep.subr.bf16.mxu0 %v4383_v29  ;;  %v3727_v33 = vcombine.low %v1204_v26, %v1208_v57  ;;  %v981_v53 = vshll.u32 %v3681_v35, 16  ;;  %v986_v9 = vshrl.u32 %v3682_v18, 16  ;;  %v989_v12 = vshll.u32 %v3682_v18, 16  ;;  %v3689_v35 = vld [vmem:[%s4609_s29 + $0x3c] sm:$0x1]  ;;  %v4387_v54 = vld [vmem:[%s5576_s2 + $0x60] sm:$0xff]  }
  0x3f   : > { %v951_v3 = vrot.slane %v950_v38, 4  ;;  %v964_v13 = vor.u32 %v963_v2, %v960_v0  ;;  %v974_v14 = vrot.slane %v972_v5, 4  ;;  %v977_v15 = vrot.slane %v975_v6, 5  ;;  %v3684_v47 = vld [vmem:[%s4609_s29 + $0x28] sm:$0xf] }
  0x40   : > { %v983_v19 = vrot.slane %v981_v53, 5  ;;  %v988_v20 = vrot.slane %v986_v9, 4  ;;  %v991_v21 = vrot.slane %v989_v12, 5  ;;  %v995_v22 = vshll.u32 %v4774_v39, 16  ;;  %v3686_v52 = vld [vmem:[%s4609_s29 + $0x30] sm:$0xf] }
  0x41   : > { %4160 = vmatpush3.bf16.msra.mxu0 %v4383_v29  ;;  %v956_v24 = vsel %vm4638_vm3, %v951_v3, %v955_v63  ;;  %v965_v11 = vrot.slane %v964_v13, 4  ;;  %v978_v25 = vor.u32 %v977_v15, %v974_v14  ;;  %v1211_v29 = vrot.slane %v3685_v16, 5  ;;  %v3688_v59 = vld [vmem:[%s4609_s29 + $0x38] sm:$0xf]  ;;  %v3690_v63 = vld [vmem:[%s4609_s29 + $0x40] sm:$0xf] }
  0x42   : > { %4181 = vmatprep.subr.bf16.mxu0 %v4792_v32  ;;  %v992_v30 = vor.u32 %v991_v21, %v988_v20  ;;  %v997_v31 = vrot.slane %v995_v22, 5  ;;  %v3722_v4 = vrot.slane %v3710_v27, 9  ;;  %v3723_v34 = vrot.slane %v3711_v28, 9  ;;  %v3760_v28 = vld [vmem:[%s4609_s29 + $0x18] sm:$0xf] }
  0x43   : > { %4174 = vmatmul.mubr.msk.bf16.vlgmr.msra.gmra.mxu1 %vm428_vm2, %v3727_v33  ;;  %v979_v37 = vrot.slane %v978_v25, 4  ;;  %v1215_v39 = vrot.slane %v3687_v10, 5  ;;  %v3724_v46 = vrot.slane %v3712_v41, 9  ;;  %v1219_v50 = vrot.slane %v3689_v35, 5  ;;  %v3762_v41 = vld [vmem:[%s4609_s29 + $0x20] sm:$0xf] }
  0x44   : > { %4142 = vmatmul.mubr.msk.bf16.gmra.mxu0 %vm428_vm2, %v3647_v42  ;;  %4194 = vmatpush3.bf16.msra.mxu1 %v4739_v7  ;;  %v970_v7 = vsel %vm4638_vm3, %v965_v11, %v969_v8  ;;  %v993_v43 = vrot.slane %v992_v30, 4  ;;  %v1212_v44 = vsel %vm4704_vm6, %v3722_v4, %v1211_v29  ;;  %v3725_v51 = vrot.slane %v3713_v45, 9  ;;  %v4866_v4 = vld [vmem:[%s4609_s29 + $0x1c] sm:$0x1]  ;;  %v4876_v45 = vld [vmem:[%s4609_s29 + $0x24] sm:$0x1] }
  0x45   : > { %4195 = vmatprep.subr.bf16.mxu1 %v4388_v58  ;;  %v3696_v42 = vcombine.low %v956_v24, %v970_v7  ;;  %v984_v48 = vsel %vm4638_vm3, %v979_v37, %v983_v19  ;;  %v1216_v49 = vsel %vm4704_vm6, %v3723_v34, %v1215_v39  ;;  %v1223_v56 = vrot.slane %v4824_v40, 5  ;;  %v4858_v19 = vld [vmem:[%s5576_s2 + $0x88] sm:$0xff]  }
  0x46   : > { %v998_v26 = vsel %vm4638_vm3, %v993_v43, %v997_v31  ;;  %v3728_v55 = vcombine.low %v1212_v44, %v1216_v49  ;;  %v1000_v57 = vshrl.u32 %v3684_v47, 16  ;;  %v1220_v61 = vsel %vm4704_vm6, %v3724_v46, %v1219_v50  ;;  %v3764_v50 = vld [vmem:[%s4609_s29 + $0x28] sm:$0xf] }
  0x47   : > { %4161 = vmatprep.mubr.msk.bf16.mxu0 %vm428_vm2, %v3696_v42  ;;  %v3697_v60 = vcombine.low %v984_v48, %v998_v26  ;;  %v1003_v62 = vshll.u32 %v3684_v47, 16  ;;  %v1009_v33 = vshll.u32 %v3685_v16, 16  ;;  %v1224_v0 = vsel %vm4704_vm6, %v3725_v51, %v1223_v56  ;;  %v3758_v16 = vld [vmem:[%s4609_s29 + $0x10] sm:$0xf] }
  0x48   : > { %4196 = vmatpush3.bf16.msra.mxu1 %v4388_v58  ;;  %4177 = vmatprep.mubr.msk.bf16.mxu1 %vm428_vm2, %v3728_v55  ;;  %v1002_v1 = vrot.slane %v1000_v57, 4  ;;  %v1014_v18 = vshrl.u32 %v3686_v52, 16  ;;  %v1017_v38 = vshll.u32 %v3686_v52, 16  ;;  %v3729_v2 = vcombine.low %v1220_v61, %v1224_v0  ;;  %v4883_v55 = vld [vmem:[%s4609_s29 + $0x2c] sm:$0x1] }
  0x49   : > { %4217 = vmatprep.subr.bf16.mxu1 %v4810_v17  ;;  %v1005_v5 = vrot.slane %v1003_v62, 5  ;;  %v1011_v6 = vrot.slane %v1009_v33, 5  ;;  %v1023_v58 = vshll.u32 %v3687_v10, 16  ;;  %v1028_v9 = vshrl.u32 %v3688_v59, 16  ;;  %v4861_v10 = vld [vmem:[%s4609_s29 + $0x14] sm:$0x1] }
  0x4a   : > { %v1016_v8 = vrot.slane %v1014_v18, 4  ;;  %v1019_v53 = vrot.slane %v1017_v38, 5  ;;  %v1031_v12 = vshll.u32 %v3688_v59, 16  ;;  %v1037_v14 = vshll.u32 %v3689_v35, 16 }
  0x4b   : > { %4178 = vmatmul.mubr.msk.bf16.gmra.mxu1 %vm428_vm2, %v3729_v2  ;;  %v1006_v3 = vor.u32 %v1005_v5, %v1002_v1  ;;  %v1025_v13 = vrot.slane %v1023_v58, 5  ;;  %v1042_v15 = vshrl.u32 %v3690_v63, 16  ;;  %v1030_v20 = vrot.slane %v1028_v9, 4 }
  0x4c   : > { %4162 = vmatmul.mubr.msk.bf16.vlgmr.msra.gmra.mxu0 %vm428_vm2, %v3697_v60  ;;  %v1033_v21 = vrot.slane %v1031_v12, 5  ;;  %v1045_v22 = vshll.u32 %v3690_v63, 16  ;;  %v1039_v11 = vrot.slane %v1037_v14, 5  ;;  %v1051_v27 = vshll.u32 %v4824_v40, 16  ;;  %v4389_v63 = vld [vmem:[%s4609_s29 + $0x10] ss:$8 sps:$4 sm:$0xff]  }
  0x4d   : > { %4182 = vmatpush3.bf16.msra.mxu0 %v4792_v32  ;;  %v1020_v32 = vor.u32 %v1019_v53, %v1016_v8  ;;  %v1007_v24 = vrot.slane %v1006_v3, 4  ;;  %v1044_v25 = vrot.slane %v1042_v15, 4  ;;  %v1490_v34 = vshrl.u32 %v3758_v16, 16 }
  0x4e   : > { %4183 = vmatprep.subr.bf16.mxu0 %v4387_v54  ;;  %v1034_v30 = vor.u32 %v1033_v21, %v1030_v20  ;;  %v1047_v31 = vrot.slane %v1045_v22, 5  ;;  %v1053_v7 = vrot.slane %v1051_v27, 5  ;;  %v1493_v37 = vshll.u32 %v3758_v16, 16  ;;  %v3766_v20 = vld [vmem:[%s4609_s29 + $0x30] sm:$0xf] }
  0x4f   : > { %v1021_v29 = vrot.slane %v1020_v32, 4  ;;  %v1012_v35 = vsel %vm4638_vm3, %v1007_v24, %v1011_v6  ;;  %v1499_v39 = vshll.u32 %v4861_v10, 16  ;;  %v1492_v44 = vrot.slane %v1490_v34, 4  ;;  %v4391_v32 = vld [vmem:[%s4609_s29 + $0x20] ss:$8 sps:$4 sm:$0xff]  }
  0x50   : > { %v1035_v42 = vrot.slane %v1034_v30, 4  ;;  %v1048_v43 = vor.u32 %v1047_v31, %v1044_v25  ;;  %v1495_v47 = vrot.slane %v1493_v37, 5  ;;  %v1504_v49 = vshrl.u32 %v3760_v28, 16  ;;  %v4898_v21 = vld [vmem:[%s4609_s29 + $0x34] sm:$0x1] }
  0x51   : > { %4184 = vmatpush3.bf16.msra.mxu0 %v4387_v54  ;;  %v1026_v40 = vsel %vm4638_vm3, %v1021_v29, %v1025_v13  ;;  %v1501_v48 = vrot.slane %v1499_v39, 5  ;;  %v1507_v54 = vshll.u32 %v3760_v28, 16  ;;  %v1513_v26 = vshll.u32 %v4866_v4, 16  ;;  %v4904_v25 = vld [vmem:[%s4609_s29 + $0x3c] sm:$0x1] }
  0x52   : > { %4205 = vmatprep.subr.bf16.mxu0 %v4858_v19  ;;  %v3698_v46 = vcombine.low %v1012_v35, %v1026_v40  ;;  %v1040_v51 = vsel %vm4638_vm3, %v1035_v42, %v1039_v11  ;;  %v1049_v52 = vrot.slane %v1048_v43, 4  ;;  %v1496_v56 = vor.u32 %v1495_v47, %v1492_v44  ;;  %v3768_v11 = vld [vmem:[%s4609_s29 + $0x38] sm:$0xf]  ;;  %v3770_v35 = vld [vmem:[%s4609_s29 + $0x40] sm:$0xf] }
  0x53   : > { %v1506_v57 = vrot.slane %v1504_v49, 4  ;;  %v1518_v59 = vshrl.u32 %v3762_v41, 16  ;;  %v1521_v60 = vshll.u32 %v3762_v41, 16  ;;  %v1509_v62 = vrot.slane %v1507_v54, 5  ;;  %v3772_v42 = vld [vmem:[%s4609_s29 + $0x48] sm:$0xf] }
  0x54   : > { %4165 = vmatprep.mubr.msk.bf16.mxu0 %vm428_vm2, %v3698_v46  ;;  %v1054_v61 = vsel %vm4638_vm3, %v1049_v52, %v1053_v7  ;;  %v1527_v33 = vshll.u32 %v4876_v45, 16  ;;  %v1497_v1 = vrot.slane %v1496_v56, 4  ;;  %v1515_v5 = vrot.slane %v1513_v26, 5  ;;  %v4911_v7 = vld [vmem:[%s4609_s29 + $0x44] sm:$0x1] }
  0x55   : > { %v3699_v0 = vcombine.low %v1040_v51, %v1054_v61  ;;  %v1520_v18 = vrot.slane %v1518_v59, 4  ;;  %v1523_v38 = vrot.slane %v1521_v60, 5  ;;  %v1510_v2 = vor.u32 %v1509_v62, %v1506_v57  ;;  %v4394_v43 = vld [vmem:[%s5576_s2 + $0x80] sm:$0xff]   ;;  %v4393_v60 = vld [vmem:[%s4609_s29 + $0x30] ss:$8 sps:$4 sm:$0xff]  }
  0x56   : > { %v1532_v6 = vshrl.u32 %v3764_v50, 16  ;;  %v1535_v58 = vshll.u32 %v3764_v50, 16  ;;  %v1529_v53 = vrot.slane %v1527_v33, 5  ;;  %v1541_v9 = vshll.u32 %v4883_v55, 16  ;;  %v4930_v61 = vld [vmem:[%s5577_s3 + $0x10] sm:$0xff]  }
  0x57   : > { %4166 = vmatmul.mubr.msk.bf16.gmra.mxu0 %vm428_vm2, %v3699_v0  ;;  %v1524_v8 = vor.u32 %v1523_v38, %v1520_v18  ;;  %v1502_v12 = vsel %vm4638_vm3, %v1497_v1, %v1501_v48  ;;  %v1511_v3 = vrot.slane %v1510_v2, 4  ;;  %v1546_v27 = vshrl.u32 %v3766_v20, 16  ;;  %v4920_v48 = vld [vmem:[%s4609_s29 + $0x4c] sm:$0x1] }
  0x58   : > { %v1534_v13 = vrot.slane %v1532_v6, 4  ;;  %v1537_v14 = vrot.slane %v1535_v58, 5  ;;  %4185 = vmatprep.mubr.msk.bf16.mxu0 %vm428_vm2, %v4389_v63  ;;  %v1543_v16 = vrot.slane %v1541_v9, 5  ;;  %v1549_v28 = vshll.u32 %v3766_v20, 16  ;;  %v4940_v2 = vld [vmem:[%s5577_s3 + $0x8] sm:$0xff]  }
  0x59   : > { %v1525_v15 = vrot.slane %v1524_v8, 4  ;;  %v1516_v22 = vsel %vm4638_vm3, %v1511_v3, %v1515_v5  ;;  %v1555_v31 = vshll.u32 %v4898_v21, 16  ;;  %v1560_v34 = vshrl.u32 %v3768_v11, 16  ;;  %v3789_v20 = vld [vmem:[%s4609_s29 + $0x18] sm:$0xe] }
  0x5a   : > { %v1538_v24 = vor.u32 %v1537_v14, %v1534_v13  ;;  %v3778_v29 = vcombine.low %v1502_v12, %v1516_v22  ;;  %v1548_v39 = vrot.slane %v1546_v27, 4  ;;  %v1551_v41 = vrot.slane %v1549_v28, 5  ;;  %v3790_v27 = vld [vmem:[%s4609_s29 + $0x20] sm:$0xe]  ;;  %v3791_v28 = vld [vmem:[%s4609_s29 + $0x28] sm:$0xe] }
  0x5b   : > { %v1530_v30 = vsel %vm4638_vm3, %v1525_v15, %v1529_v53  ;;  %v1563_v40 = vshll.u32 %v3768_v11, 16  ;;  %v1557_v44 = vrot.slane %v1555_v31, 5  ;;  %v1562_v46 = vrot.slane %v1560_v34, 4  ;;  %v4395_v53 = vld [vmem:[%s4609_s29 + $0x40] ss:$8 sps:$4 sm:$0xff]  }
  0x5c   : > { %v1539_v37 = vrot.slane %v1538_v24, 4  ;;  %4197 = vmatprep.mubr.msk.bf16.mxu1 %vm428_vm2, %v3778_v29  ;;  %v1569_v47 = vshll.u32 %v4904_v25, 16  ;;  %v1574_v49 = vshrl.u32 %v3770_v35, 16  ;;  %v1552_v51 = vor.u32 %v1551_v41, %v1548_v39 }
  0x5d   : > { %v1565_v52 = vrot.slane %v1563_v40, 5  ;;  %v1577_v54 = vshll.u32 %v3770_v35, 16  ;;  %v1583_v59 = vshll.u32 %v4911_v7, 16  ;;  %v1588_v0 = vshrl.u32 %v3772_v42, 16 }
  0x5e   : > { %v1544_v50 = vsel %vm4638_vm3, %v1539_v37, %v1543_v16  ;;  %v1571_v56 = vrot.slane %v1569_v47, 5  ;;  %v1576_v57 = vrot.slane %v1574_v49, 4  ;;  %v1553_v62 = vrot.slane %v1552_v51, 4  ;;  %v3795_v49 = vld [vmem:[%s4609_s29 + $0x48] sm:$0xe]  ;;  %v4991_v51 = vld [vmem:[%s5577_s3 + $0x18] sm:$0xff]  }
  0x5f   : > { %v3779_v26 = vcombine.low %v1530_v30, %v1544_v50  ;;  %4186 = vmatmul.mubr.msk.bf16.vlgmr.msra.gmra.mxu0 %vm428_vm2, %v4391_v32  ;;  %v1566_v33 = vor.u32 %v1565_v52, %v1562_v46  ;;  %v1579_v63 = vrot.slane %v1577_v54, 5  ;;  %v1591_v1 = vshll.u32 %v3772_v42, 16  ;;  %v3788_v32 = vld [vmem:[%s4609_s29 + $0x10] sm:$0xe]  ;;  %v3794_v46 = vld [vmem:[%s4609_s29 + $0x40] sm:$0xe] }
  0x60   : > { %4206 = vmatpush3.bf16.msra.mxu0 %v4858_v19  ;;  %v1597_v18 = vshll.u32 %v4920_v48, 16  ;;  %4189 = vmatprep.mubr.msk.bf16.mxu0 %vm428_vm2, %v4393_v60  ;;  %v1741_v38 = vrot.slane %v4861_v10, 5  ;;  %v1558_v19 = vsel %vm4638_vm3, %v1553_v62, %v1557_v44  ;;  %v1590_v58 = vrot.slane %v1588_v0, 4  ;;  %v3793_v44 = vld [vmem:[%s4609_s29 + $0x38] sm:$0xe] }
  0x61   : > { %4198 = vmatmul.mubr.msk.bf16.vlgmr.msra.gmra.mxu1 %vm428_vm2, %v3779_v26  ;;  %v1567_v5 = vrot.slane %v1566_v33, 4  ;;  %v1580_v6 = vor.u32 %v1579_v63, %v1576_v57  ;;  %4207 = vmatprep.subr.bf16.mxu0 %v4394_v43  ;;  %v1585_v10 = vrot.slane %v1583_v59, 5  ;;  %v1593_v8 = vrot.slane %v1591_v1, 5  ;;  %v4397_v52 = vld [vmem:[%s4947_s25 + $0x10] ss:$8 sps:$4 sm:$0xff]  }
  0x62   : > { %4218 = vmatpush3.bf16.msra.mxu1 %v4810_v17  ;;  %v1745_v17 = vrot.slane %v4866_v4, 5  ;;  %v1749_v3 = vrot.slane %v4876_v45, 5  ;;  %v1599_v15 = vrot.slane %v1597_v18, 5  ;;  %v1753_v16 = vrot.slane %v4883_v55, 5  ;;  %v4396_v4 = vld [vmem:[%s4947_s25] ss:$8 sps:$4 sm:$0xff]  }
  0x63   : > { %4237 = vmatprep.subr.bf16.mxu1 %v4930_v61  ;;  %v1572_v9 = vsel %vm4638_vm3, %v1567_v5, %v1571_v56  ;;  %v1581_v12 = vrot.slane %v1580_v6, 4  ;;  %v1594_v14 = vor.u32 %v1593_v8, %v1590_v58  ;;  %v3800_v45 = vrot.slane %v3788_v32, 9  ;;  %v2005_v57 = vld [vmem:[%s4947_s25 + $0x4] sm:$0x1]  ;;  %v4400_v59 = vld [vmem:[%s4947_s25 + $0x20] ss:$8 sps:$4 sm:$0xff]  }
  0x64   : > { %4208 = vmatpush3.bf16.msra.mxu0 %v4394_v43  ;;  %v3780_v13 = vcombine.low %v1558_v19, %v1572_v9  ;;  %v3801_v11 = vrot.slane %v3789_v20, 9  ;;  %v3802_v31 = vrot.slane %v3790_v27, 9  ;;  %v3803_v37 = vrot.slane %v3791_v28, 9  ;;  %v3792_v43 = vld [vmem:[%s4609_s29 + $0x30] sm:$0xe]  ;;  %s4009_s29 = sshll.u32 %s4484_s21, 9 }
  0x65   : > { %4227 = vmatprep.subr.bf16.mxu0 %v4940_v2  ;;  %v1586_v22 = vsel %vm4638_vm3, %v1581_v12, %v1585_v10  ;;  %v1595_v24 = vrot.slane %v1594_v14, 4  ;;  %v1742_v29 = vsel %vm4704_vm6, %v3800_v45, %v1741_v38  ;;  %v1757_v41 = vrot.slane %v4898_v21, 5  ;;  %v2007_v33 = vld [vmem:[%s4947_s25 + $0xc] sm:$0x1]  ;;  %v2238_v63 = vld [vmem:[%s4947_s25] sm:$0xe]  ;;  %s5519_s9 = scalar_lea.hbm %s5579_s5, %s4009_s29 }
  0x66   : > { %4201 = vmatprep.mubr.msk.bf16.mxu1 %vm428_vm2, %v3780_v13  ;;  %v1746_v30 = vsel %vm4704_vm6, %v3801_v11, %v1745_v17  ;;  %v1750_v39 = vsel %vm4704_vm6, %v3802_v31, %v1749_v3  ;;  %v1761_v40 = vrot.slane %v4904_v25, 5  ;;  %v1754_v42 = vsel %vm4704_vm6, %v3803_v37, %v1753_v16  ;;  %v2239_v0 = vld [vmem:[%s4947_s25 + $0x8] sm:$0xe]  ;;  %v2009_v38 = vld [vmem:[%s4947_s25 + $0x14] sm:$0x1]  ;;  %s5529_s21 = scalar_lea.sflag [#allocation3], %s244_s17 }
  0x67   : > { %4190 = vmatmul.mubr.msk.bf16.gmra.mxu0 %vm428_vm2, %v4395_v53  ;;  %v1600_v55 = vsel %vm4638_vm3, %v1595_v24, %v1599_v15  ;;  %v3808_v35 = vcombine.low %v1742_v29, %v1746_v30  ;;  %v3809_v47 = vcombine.low %v1750_v39, %v1754_v42  ;;  %v3804_v21 = vrot.slane %v3792_v43, 9  ;;  %v2011_v19 = vld [vmem:[%s4947_s25 + $0x1c] sm:$0x1]  ;;  %v2240_v8 = vld [vmem:[%s4947_s25 + $0x10] sm:$0xe] }
  0x68   : > { %v3781_v34 = vcombine.low %v1586_v22, %v1600_v55  ;;  %v3805_v25 = vrot.slane %v3793_v44, 9  ;;  %v3806_v50 = vrot.slane %v3794_v46, 9  ;;  %v1765_v54 = vrot.slane %v4911_v7, 5  ;;  %v2241_v53 = vld [vmem:[%s4947_s25 + $0x18] sm:$0xe] }
  0x69   : > { %4209 = vmatprep.mubr.msk.bf16.mxu0 %vm428_vm2, %v3808_v35  ;;  %v3807_v26 = vrot.slane %v3795_v49, 9  ;;  %v1769_v56 = vrot.slane %v4920_v48, 5  ;;  %v1758_v60 = vsel %vm4704_vm6, %v3804_v21, %v1757_v41  ;;  %v3840_v18 = vrot.slane %v2238_v63, 9  ;;  %v2004_v16 = vld [vmem:[%s4947_s25] sm:$0xf] }
  0x6a   : > { %4202 = vmatmul.mubr.msk.bf16.gmra.mxu1 %vm428_vm2, %v3781_v34  ;;  %v1762_v62 = vsel %vm4704_vm6, %v3805_v25, %v1761_v40  ;;  %v1766_v48 = vsel %vm4704_vm6, %v3806_v50, %v1765_v54  ;;  %v2267_v6 = vrot.slane %v2005_v57, 5  ;;  %v3841_v58 = vrot.slane %v2239_v0, 9  ;;  %v2006_v32 = vld [vmem:[%s4947_s25 + $0x8] sm:$0xf]  ;;  %v2008_v55 = vld [vmem:[%s4947_s25 + $0x10] sm:$0xf] }
  0x6b   : > { %4219 = vmatprep.mubr.msk.bf16.mxu1 %vm1918_vm7, %v4396_v4  ;;  %v3810_v7 = vcombine.low %v1758_v60, %v1762_v62  ;;  %v1770_v1 = vsel %vm4704_vm6, %v3807_v26, %v1769_v56  ;;  %v2271_v10 = vrot.slane %v2007_v33, 5  ;;  %v3842_v9 = vrot.slane %v2240_v8, 9  ;;  %v4401_v29 = vld [vmem:[%s4947_s25 + $0x30] ss:$8 sps:$4 sm:$0xff]   ;;  %v2013_v50 = vld [vmem:[%s4947_s25 + $0x24] sm:$0x1] }
  0x6c   : > { %v3811_v5 = vcombine.low %v1766_v48, %v1770_v1  ;;  %v2275_v12 = vrot.slane %v2009_v38, 5  ;;  %v2279_v17 = vrot.slane %v2011_v19, 5  ;;  %v2033_v3 = vshll.u32 %v2005_v57, 16  ;;  %v5046_v57 = vld [vmem:[%s4947_s25 + $0x2c] sm:$0x1] }
  0x6d   : > { %v2268_v13 = vsel %vm4704_vm6, %v3840_v18, %v2267_v6  ;;  %v2272_v14 = vsel %vm4704_vm6, %v3841_v58, %v2271_v10  ;;  %v3843_v15 = vrot.slane %v2241_v53, 9  ;;  %v2047_v20 = vshll.u32 %v2007_v33, 16  ;;  %v2242_v63 = vld [vmem:[%s4947_s25 + $0x20] sm:$0xe]  ;;  %v2243_v0 = vld [vmem:[%s4947_s25 + $0x28] sm:$0xe] }
  0x6e   : > { %v3848_v22 = vcombine.low %v2268_v13, %v2272_v14  ;;  %v2024_v24 = vshrl.u32 %v2004_v16, 16  ;;  %v2027_v4 = vshll.u32 %v2004_v16, 16  ;;  %v5033_v45 = vsel %vm4704_vm6, %v3842_v9, %v2275_v12  ;;  %v2244_v8 = vld [vmem:[%s4947_s25 + $0x30] sm:$0xe]  ;;  %v2012_v13 = vld [vmem:[%s4947_s25 + $0x20] sm:$0xf] }
  0x6f   : > { %4210 = vmatmul.mubr.msk.bf16.vlgmr.msra.gmra.mxu0 %vm428_vm2, %v3809_v47  ;;  %v5037_v11 = vsel %vm4704_vm6, %v3843_v15, %v2279_v17  ;;  %v2038_v27 = vshrl.u32 %v2006_v32, 16  ;;  %v2041_v28 = vshll.u32 %v2006_v32, 16  ;;  %v2035_v34 = vrot.slane %v2033_v3, 5  ;;  %v2245_v17 = vld [vmem:[%s4947_s25 + $0x38] sm:$0xe] }
  0x70   : > { %4228 = vmatpush3.bf16.msra.mxu0 %v4940_v2  ;;  %v5018_v2 = vld [vmem:[%s5577_s3 + $0x20] sm:$0xff]   ;;  %4213 = vmatprep.mubr.msk.bf16.mxu0 %vm428_vm2, %v3810_v7  ;;  %v2026_v30 = vrot.slane %v2024_v24, 4  ;;  %v2029_v31 = vrot.slane %v2027_v4, 5  ;;  %v2049_v35 = vrot.slane %v2047_v20, 5  ;;  %v2052_v41 = vshrl.u32 %v2008_v55, 16 }
  0x71   : > { %4247 = vmatprep.subr.bf16.mxu0 %v4991_v51  ;;  %v2040_v37 = vrot.slane %v2038_v27, 4  ;;  %v2043_v39 = vrot.slane %v2041_v28, 5  ;;  %v2055_v40 = vshll.u32 %v2008_v55, 16  ;;  %v2061_v43 = vshll.u32 %v2009_v38, 16  ;;  %v5056_v38 = vld [vmem:[%s4947_s25 + $0x34] sm:$0x1] }
  0x72   : > { %4220 = vmatmul.mubr.msk.bf16.vlgmr.msra.gmra.mxu1 %vm1918_vm7, %v4397_v52  ;;  %v2030_v42 = vor.u32 %v2029_v31, %v2026_v30  ;;  %v2054_v21 = vrot.slane %v2052_v41, 4  ;;  %v2075_v49 = vshll.u32 %v2011_v19, 16  ;;  %v3844_v1 = vrot.slane %v2242_v63, 9  ;;  %v5059_v19 = vld [vmem:[%s4947_s25 + $0x3c] sm:$0x1]  ;;  %v5086_v30 = vld [vmem:[%s5577_s3 + $0x28] sm:$0xff]  }
  0x73   : > { %4238 = vmatpush3.bf16.msra.mxu1 %v4930_v61  ;;  %4223 = vmatprep.mubr.msk.bf16.mxu1 %vm1918_vm7, %v4400_v59  ;;  %v2010_v61 = vld [vmem:[%s4947_s25 + $0x18] sm:$0xf]  ;;  %v2044_v47 = vor.u32 %v2043_v39, %v2040_v37  ;;  %v2057_v25 = vrot.slane %v2055_v40, 5  ;;  %v2063_v54 = vrot.slane %v2061_v43, 5  ;;  %v3849_v59 = vcombine.low %v5033_v45, %v5037_v11  ;;  %v2014_v20 = vld [vmem:[%s4947_s25 + $0x28] sm:$0xf] }
  0x74   : > { %4257 = vmatprep.subr.bf16.mxu1 %v5018_v2  ;;  %v2066_v44 = vshrl.u32 %v2010_v61, 16  ;;  %v2069_v46 = vshll.u32 %v2010_v61, 16  ;;  %v2031_v52 = vrot.slane %v2030_v42, 4  ;;  %v2077_v33 = vrot.slane %v2075_v49, 5  ;;  %v2018_v37 = vld [vmem:[%s4947_s25 + $0x38] sm:$0xf] }
  0x75   : > { %v2045_v60 = vrot.slane %v2044_v47, 4  ;;  %v2058_v62 = vor.u32 %v2057_v25, %v2054_v21  ;;  %v2283_v18 = vrot.slane %v2013_v50, 5  ;;  %v3845_v58 = vrot.slane %v2243_v0, 9  ;;  %v5094_v39 = vld [vmem:[%s5577_s3 + $0x30] sm:$0xff]   ;;  %v3876_v25 = vld [vmem:[%s4947_s25 + $0x8] sm:$0xf] }
  0x76   : > { %v2068_v26 = vrot.slane %v2066_v44, 4  ;;  %v2071_v56 = vrot.slane %v2069_v46, 5  ;;  %v2036_v7 = vsel %vm4638_vm3, %v2031_v52, %v2035_v34  ;;  %v2287_v10 = vrot.slane %v5046_v57, 5  ;;  %v5112_v0 = vld [vmem:[%s4947_s25 + $0x14] sm:$0x1] }
  0x77   : > { %4214 = vmatmul.mubr.msk.bf16.gmra.mxu0 %vm428_vm2, %v3811_v5  ;;  %v2050_v5 = vsel %vm4638_vm3, %v2045_v60, %v2049_v35  ;;  %v2059_v6 = vrot.slane %v2058_v62, 4  ;;  %v2284_v12 = vsel %vm4704_vm6, %v3844_v1, %v2283_v18  ;;  %v3846_v3 = vrot.slane %v2244_v8, 9  ;;  %v3878_v60 = vld [vmem:[%s4947_s25 + $0x10] sm:$0xf]  ;;  %v5119_v8 = vld [vmem:[%s4947_s25 + $0x1c] sm:$0x1] }
  0x78   : > { %v2072_v48 = vor.u32 %v2071_v56, %v2068_v26  ;;  %v3829_v53 = vcombine.low %v2036_v7, %v2050_v5  ;;  %v2288_v15 = vsel %vm4704_vm6, %v3845_v58, %v2287_v10  ;;  %v2291_v16 = vrot.slane %v5056_v38, 5  ;;  %v5105_v26 = vld [vmem:[%s4947_s25 + $0xc] sm:$0x1] }
  0x79   : > { %v2064_v14 = vsel %vm4638_vm3, %v2059_v6, %v2063_v54  ;;  %v3847_v32 = vrot.slane %v2245_v17, 9  ;;  %v3850_v24 = vcombine.low %v2284_v12, %v2288_v15  ;;  %v2295_v4 = vrot.slane %v5059_v19, 5  ;;  %v3882_v15 = vld [vmem:[%s4947_s25 + $0x20] sm:$0xf] }
  0x7a   : > { %4224 = vmatmul.mubr.msk.bf16.gmra.mxu1 %vm1918_vm7, %v4401_v29  ;;  %v2073_v9 = vrot.slane %v2072_v48, 4  ;;  %4229 = vmatprep.mubr.msk.bf16.mxu0 %vm1918_vm7, %v3829_v53  ;;  %v2080_v45 = vshrl.u32 %v2012_v13, 16  ;;  %v2292_v27 = vsel %vm4704_vm6, %v3846_v3, %v2291_v16  ;;  %v2083_v28 = vshll.u32 %v2012_v13, 16  ;;  %v2016_v29 = vld [vmem:[%s4947_s25 + $0x30] sm:$0xf] }
  0x7b   : > { %4239 = vmatprep.mubr.msk.bf16.mxu1 %vm1918_vm7, %v3848_v22  ;;  %v2089_v55 = vshll.u32 %v2013_v50, 16  ;;  %v2296_v31 = vsel %vm4704_vm6, %v3847_v32, %v2295_v4  ;;  %v2094_v35 = vshrl.u32 %v2014_v20, 16  ;;  %v2097_v61 = vshll.u32 %v2014_v20, 16 }
  0x7c   : > { %v2078_v22 = vsel %vm4638_vm3, %v2073_v9, %v2077_v33  ;;  %v2082_v34 = vrot.slane %v2080_v45, 4  ;;  %v3851_v41 = vcombine.low %v2292_v27, %v2296_v31  ;;  %v2085_v40 = vrot.slane %v2083_v28, 5  ;;  %v4404_v28 = vld [vmem:[%s4947_s25 + $0x8] ss:$8 sps:$4 sm:$0xff]  }
  0x7d   : > { %v3830_v11 = vcombine.low %v2064_v14, %v2078_v22  ;;  %v2091_v42 = vrot.slane %v2089_v55, 5  ;;  %v2103_v43 = vshll.u32 %v5046_v57, 16  ;;  %v2096_v44 = vrot.slane %v2094_v35, 4 }
  0x7e   : > { %v2099_v46 = vrot.slane %v2097_v61, 5  ;;  %v2108_v47 = vshrl.u32 %v2016_v29, 16  ;;  %v2111_v21 = vshll.u32 %v2016_v29, 16  ;;  %v2086_v49 = vor.u32 %v2085_v40, %v2082_v34 }
  0x7f   : > { %4230 = vmatmul.mubr.msk.bf16.vlgmr.msra.gmra.mxu0 %vm1918_vm7, %v3830_v11  ;;  %v2105_v50 = vrot.slane %v2103_v43, 5  ;;  %v2117_v52 = vshll.u32 %v5056_v38, 16  ;;  %v2122_v54 = vshrl.u32 %v2018_v37, 16  ;;  %v2131_v63 = vshll.u32 %v5059_v19, 16  ;;  %v3880_v38 = vld [vmem:[%s4947_s25 + $0x18] sm:$0xf] }
  0x80   : > { %4248 = vmatpush3.bf16.msra.mxu0 %v4991_v51  ;;  %v2100_v56 = vor.u32 %v2099_v46, %v2096_v44  ;;  %v2110_v51 = vrot.slane %v2108_v47, 4  ;;  %v2113_v57 = vrot.slane %v2111_v21, 5  ;;  %v2544_v18 = vshrl.u32 %v3876_v25, 16  ;;  %v3884_v46 = vld [vmem:[%s4947_s25 + $0x28] sm:$0xf] }
  0x81   : > { %4267 = vmatprep.subr.bf16.mxu0 %v5086_v30  ;;  %v2119_v62 = vrot.slane %v2117_v52, 5  ;;  %v2124_v33 = vrot.slane %v2122_v54, 4  ;;  %v2133_v6 = vrot.slane %v2131_v63, 5  ;;  %v2547_v58 = vshll.u32 %v3876_v25, 16 }
  0x82   : > { %4240 = vmatmul.mubr.msk.bf16.vlgmr.msra.gmra.mxu1 %vm1918_vm7, %v3849_v59  ;;  %v2125_v59 = vshll.u32 %v2018_v37, 16  ;;  %v2101_v7 = vrot.slane %v2100_v56, 4  ;;  %v2114_v48 = vor.u32 %v2113_v57, %v2110_v51  ;;  %v2553_v10 = vshll.u32 %v5105_v26, 16 }
  0x83   : > { %4258 = vmatpush3.bf16.msra.mxu1 %v5018_v2  ;;  %4243 = vmatprep.mubr.msk.bf16.mxu1 %vm1918_vm7, %v3850_v24  ;;  %v2087_v2 = vrot.slane %v2086_v49, 4  ;;  %v2546_v12 = vrot.slane %v2544_v18, 4  ;;  %v2549_v3 = vrot.slane %v2547_v58, 5  ;;  %v2558_v14 = vshrl.u32 %v3878_v60, 16  ;;  %v5129_v24 = vld [vmem:[%s4947_s25 + $0x24] sm:$0x1] }
  0x84   : > { %4277 = vmatprep.subr.bf16.mxu1 %v5094_v39  ;;  %v2127_v1 = vrot.slane %v2125_v59, 5  ;;  %v2106_v19 = vsel %vm4638_vm3, %v2101_v7, %v2105_v50  ;;  %v2115_v53 = vrot.slane %v2114_v48, 4  ;;  %v2555_v13 = vrot.slane %v2553_v10, 5  ;;  %v5142_v49 = vld [vmem:[%s4947_s25 + $0x2c] sm:$0x1] }
  0x85   : > { %v2092_v5 = vsel %vm4638_vm3, %v2087_v2, %v2091_v42  ;;  %v2561_v20 = vshll.u32 %v3878_v60, 16  ;;  %v2567_v22 = vshll.u32 %v5112_v0, 16  ;;  %v2550_v4 = vor.u32 %v2549_v3, %v2546_v12  ;;  %v3886_v50 = vld [vmem:[%s4947_s25 + $0x30] sm:$0xf]  ;;  %v4406_v2 = vld [vmem:[%s4947_s25 + $0x18] ss:$8 sps:$4 sm:$0xff]  }
  0x86   : > { %v2128_v9 = vor.u32 %v2127_v1, %v2124_v33  ;;  %v3831_v17 = vcombine.low %v2092_v5, %v2106_v19  ;;  %v2120_v16 = vsel %vm4638_vm3, %v2115_v53, %v2119_v62  ;;  %v2560_v45 = vrot.slane %v2558_v14, 4  ;;  %v5148_v62 = vld [vmem:[%s4947_s25 + $0x34] sm:$0x1]  ;;  %v5155_v5 = vld [vmem:[%s4947_s25 + $0x3c] sm:$0x1] }
  0x87   : > { %v2572_v11 = vshrl.u32 %v3880_v38, 16  ;;  %v2575_v27 = vshll.u32 %v3880_v38, 16  ;;  %v2563_v29 = vrot.slane %v2561_v20, 5  ;;  %v2569_v31 = vrot.slane %v2567_v22, 5  ;;  %v3888_v38 = vld [vmem:[%s4947_s25 + $0x38] sm:$0xf] }
  0x88   : > { %v2129_v32 = vrot.slane %v2128_v9, 4  ;;  %4233 = vmatprep.mubr.msk.bf16.mxu0 %vm1918_vm7, %v3831_v17  ;;  %v2581_v34 = vshll.u32 %v5119_v8, 16  ;;  %v2551_v61 = vrot.slane %v2550_v4, 4  ;;  %v2586_v43 = vshrl.u32 %v3882_v15, 16  ;;  %v3890_v53 = vld [vmem:[%s4947_s25 + $0x40] sm:$0xf] }
  0x89   : > { %v2574_v37 = vrot.slane %v2572_v11, 4  ;;  %v2564_v40 = vor.u32 %v2563_v29, %v2560_v45  ;;  %v2589_v44 = vshll.u32 %v3882_v15, 16  ;;  %v2595_v25 = vshll.u32 %v5129_v24, 16  ;;  %v5167_v14 = vld [vmem:[%s5577_s3 + $0x38] sm:$0xff]   ;;  %v4408_v22 = vld [vmem:[%s4947_s25 + $0x28] ss:$8 sps:$4 sm:$0xff]  }
  0x8a   : > { %4244 = vmatmul.mubr.msk.bf16.gmra.mxu1 %vm1918_vm7, %v3851_v41  ;;  %v2134_v55 = vsel %vm4638_vm3, %v2129_v32, %v2133_v6  ;;  %v2577_v41 = vrot.slane %v2575_v27, 5  ;;  %v2583_v42 = vrot.slane %v2581_v34, 5  ;;  %v2556_v47 = vsel %vm4638_vm3, %v2551_v61, %v2555_v13  ;;  %v5162_v13 = vld [vmem:[%s4947_s25 + $0x44] sm:$0x1] }
  0x8b   : > { %v3832_v35 = vcombine.low %v2120_v16, %v2134_v55  ;;  %v2600_v52 = vshrl.u32 %v3884_v46, 16  ;;  %v2565_v54 = vrot.slane %v2564_v40, 4  ;;  %v2588_v56 = vrot.slane %v2586_v43, 4  ;;  %v5178_v34 = vld [vmem:[%s5577_s3 + $0x40] sm:$0xff]  }
  0x8c   : > { %v2578_v21 = vor.u32 %v2577_v41, %v2574_v37  ;;  %v2591_v51 = vrot.slane %v2589_v44, 5  ;;  %v2603_v57 = vshll.u32 %v3884_v46, 16  ;;  %v2597_v60 = vrot.slane %v2595_v25, 5  ;;  %v4409_v25 = vld [vmem:[%s4947_s25 + $0x38] ss:$8 sps:$4 sm:$0xff]  }
  0x8d   : > { %4234 = vmatmul.mubr.msk.bf16.gmra.mxu0 %vm1918_vm7, %v3832_v35  ;;  %v2602_v33 = vrot.slane %v2600_v52, 4  ;;  %v2609_v63 = vshll.u32 %v5142_v49, 16  ;;  %v2570_v7 = vsel %vm4638_vm3, %v2565_v54, %v2569_v31  ;;  %v2614_v18 = vshrl.u32 %v3886_v50, 16 }
  0x8e   : > { %4249 = vmatprep.mubr.msk.bf16.mxu0 %vm1918_vm7, %v4404_v28  ;;  %v2579_v59 = vrot.slane %v2578_v21, 4  ;;  %v2592_v48 = vor.u32 %v2591_v51, %v2588_v56  ;;  %v2605_v1 = vrot.slane %v2603_v57, 5  ;;  %v3894_v6 = vcombine.low %v2556_v47, %v2570_v7  ;;  %v3904_v56 = vld [vmem:[%s4947_s25 + $0x10] sm:$0xe] }
  0x8f   : > { %v2611_v10 = vrot.slane %v2609_v63, 5  ;;  %v2617_v19 = vshll.u32 %v3886_v50, 16  ;;  %v2616_v17 = vrot.slane %v2614_v18, 4  ;;  %v2623_v3 = vshll.u32 %v5148_v62, 16  ;;  %v3903_v50 = vld [vmem:[%s4947_s25 + $0x8] sm:$0xe] }
  0x90   : > { %v2584_v58 = vsel %vm4638_vm3, %v2579_v59, %v2583_v42  ;;  %v2593_v9 = vrot.slane %v2592_v48, 4  ;;  %v2606_v12 = vor.u32 %v2605_v1, %v2602_v33  ;;  %4259 = vmatprep.mubr.msk.bf16.mxu1 %vm1918_vm7, %v3894_v6  ;;  %v2628_v16 = vshrl.u32 %v3888_v38, 16  ;;  %v3905_v59 = vld [vmem:[%s4947_s25 + $0x18] sm:$0xe]  ;;  %v3906_v63 = vld [vmem:[%s4947_s25 + $0x20] sm:$0xe] }
  0x91   : > { %v2619_v15 = vrot.slane %v2617_v19, 5  ;;  %v2631_v32 = vshll.u32 %v3888_v38, 16  ;;  %v2637_v20 = vshll.u32 %v5155_v5, 16  ;;  %v2625_v11 = vrot.slane %v2623_v3, 5  ;;  %v4410_v18 = vld [vmem:[%s4947_s25 + $0x10] ss:$8 sps:$4 sm:$0xff]  }
  0x92   : > { %v2598_v4 = vsel %vm4638_vm3, %v2593_v9, %v2597_v60  ;;  %v2607_v45 = vrot.slane %v2606_v12, 4  ;;  %v2642_v27 = vshrl.u32 %v3890_v53, 16  ;;  %v2630_v29 = vrot.slane %v2628_v16, 4  ;;  %v3907_v19 = vld [vmem:[%s4947_s25 + $0x28] sm:$0xe] }
  0x93   : > { %v3895_v28 = vcombine.low %v2584_v58, %v2598_v4  ;;  %v2620_v55 = vor.u32 %v2619_v15, %v2616_v17  ;;  %v2633_v31 = vrot.slane %v2631_v32, 5  ;;  %v2645_v37 = vshll.u32 %v3890_v53, 16  ;;  %v3908_v53 = vld [vmem:[%s4947_s25 + $0x30] sm:$0xe]  ;;  %v3910_v16 = vld [vmem:[%s4947_s25 + $0x40] sm:$0xe] }
  0x94   : > { %v2612_v35 = vsel %vm4638_vm3, %v2607_v45, %v2611_v10  ;;  %v2644_v61 = vrot.slane %v2642_v27, 4  ;;  %v2639_v42 = vrot.slane %v2637_v20, 5  ;;  %v2651_v43 = vshll.u32 %v5162_v13, 16  ;;  %v3976_v27 = vld [vmem:[%s4947_s25 + $0x10] sm:$0xe] }
  0x95   : > { %4250 = vmatmul.mubr.msk.bf16.vlgmr.msra.gmra.mxu0 %vm1918_vm7, %v4406_v2  ;;  %4260 = vmatmul.mubr.msk.bf16.vlgmr.msra.gmra.mxu1 %vm1918_vm7, %v3895_v28  ;;  %v2621_v41 = vrot.slane %v2620_v55, 4  ;;  %v2634_v40 = vor.u32 %v2633_v31, %v2630_v29  ;;  %v2787_v44 = vrot.slane %v5105_v26, 5  ;;  %v3913_v51 = vrot.slane %v3903_v50, 9  ;;  %v3977_v28 = vld [vmem:[%s4947_s25 + $0x18] sm:$0xe] }
  0x96   : > { %4268 = vmatpush3.bf16.msra.mxu0 %v5086_v30  ;;  %4253 = vmatprep.mubr.msk.bf16.mxu0 %vm1918_vm7, %v4408_v22  ;;  %v2647_v30 = vrot.slane %v2645_v37, 5  ;;  %v2653_v21 = vrot.slane %v2651_v43, 5  ;;  %v3914_v57 = vrot.slane %v3904_v56, 9  ;;  %v2795_v60 = vrot.slane %v5119_v8, 5  ;;  %v3950_v22 = vld [vmem:[%s4947_s25 + $0x14] sm:$0x1] }
  0x97   : > { %4287 = vmatprep.subr.bf16.mxu0 %v5167_v14  ;;  %4278 = vmatpush3.bf16.msra.mxu1 %v5094_v39  ;;  %v2626_v46 = vsel %vm4638_vm3, %v2621_v41, %v2625_v11  ;;  %v2635_v47 = vrot.slane %v2634_v40, 4  ;;  %v2791_v39 = vrot.slane %v5112_v0, 5  ;;  %v2788_v33 = vsel %vm4704_vm6, %v3913_v51, %v2787_v44  ;;  %v3952_v11 = vld [vmem:[%s4947_s25 + $0x1c] sm:$0x1]  ;;  %v4414_v55 = vld [vmem:[%s4947_s25 + $0x30] ss:$8 sps:$4 sm:$0xff]  }
  0x98   : > { %4297 = vmatprep.subr.bf16.mxu1 %v5178_v34  ;;  %v3896_v52 = vcombine.low %v2612_v35, %v2626_v46  ;;  %v2648_v54 = vor.u32 %v2647_v30, %v2644_v61  ;;  %v3915_v7 = vrot.slane %v3905_v59, 9  ;;  %v2799_v48 = vrot.slane %v5129_v24, 5  ;;  %v3956_v61 = vld [vmem:[%s4947_s25 + $0x2c] sm:$0x1]  ;;  %v3978_v43 = vld [vmem:[%s4947_s25 + $0x20] sm:$0xe] }
  0x99   : > { %v2640_v26 = vsel %vm4638_vm3, %v2635_v47, %v2639_v42  ;;  %v2792_v0 = vsel %vm4704_vm6, %v3914_v57, %v2791_v39  ;;  %v3916_v1 = vrot.slane %v3906_v63, 9  ;;  %v2803_v10 = vrot.slane %v5142_v49, 5  ;;  %v3909_v49 = vld [vmem:[%s4947_s25 + $0x38] sm:$0xe]  ;;  %v3979_v30 = vld [vmem:[%s4947_s25 + $0x28] sm:$0xe] }
  0x9a   : > { %4263 = vmatprep.mubr.msk.bf16.mxu1 %vm1918_vm7, %v3896_v52  ;;  %v2649_v2 = vrot.slane %v2648_v54, 4  ;;  %v3921_v38 = vcombine.low %v2788_v33, %v2792_v0  ;;  %v2796_v6 = vsel %vm4704_vm6, %v3915_v7, %v2795_v60  ;;  %v2807_v9 = vrot.slane %v5148_v62, 5  ;;  %v3949_v54 = vld [vmem:[%s4947_s25 + $0x10] sm:$0xf]  ;;  %v3953_v59 = vld [vmem:[%s4947_s25 + $0x20] sm:$0xf] }
  0x9b   : > { %v2800_v24 = vsel %vm4704_vm6, %v3916_v1, %v2799_v48  ;;  %v2811_v12 = vrot.slane %v5155_v5, 5  ;;  %v3917_v3 = vrot.slane %v3907_v19, 9  ;;  %v3918_v15 = vrot.slane %v3908_v53, 9  ;;  %v4411_v5 = vld [vmem:[%s4947_s25 + $0x20] ss:$8 sps:$4 sm:$0xff]  }
  0x9c   : > { %v2654_v8 = vsel %vm4638_vm3, %v2649_v2, %v2653_v21  ;;  %v3922_v17 = vcombine.low %v2796_v6, %v2800_v24  ;;  %v3919_v32 = vrot.slane %v3909_v49, 9  ;;  %v3920_v20 = vrot.slane %v3910_v16, 9  ;;  %v3955_v7 = vld [vmem:[%s4947_s25 + $0x28] sm:$0xf] }
  0x9d   : > { %4254 = vmatmul.mubr.msk.bf16.gmra.mxu0 %vm1918_vm7, %v4409_v25  ;;  %v3897_v58 = vcombine.low %v2640_v26, %v2654_v8  ;;  %v2815_v62 = vrot.slane %v5162_v13, 5  ;;  %v2804_v4 = vsel %vm4704_vm6, %v3917_v3, %v2803_v10  ;;  %v2808_v45 = vsel %vm4704_vm6, %v3918_v15, %v2807_v9  ;;  %v3954_v13 = vld [vmem:[%s4947_s25 + $0x24] sm:$0x1]  ;;  %v5274_v10 = vld [vmem:[%s4947_s25 + $0x34] sm:$0x1] }
  0x9e   : > { %4269 = vmatprep.mubr.msk.bf16.mxu0 %vm1918_vm7, %v3921_v38  ;;  %v3923_v29 = vcombine.low %v2804_v4, %v2808_v45  ;;  %v2812_v31 = vsel %vm4704_vm6, %v3919_v32, %v2811_v12  ;;  %v3986_v35 = vrot.slane %v3976_v27, 9  ;;  %v3307_v41 = vrot.slane %v3950_v22, 5  ;;  %v5277_v12 = vld [vmem:[%s4947_s25 + $0x3c] sm:$0x1]  ;;  %v3981_v32 = vld [vmem:[%s4947_s25 + $0x38] sm:$0xe] }
  0x9f   : > { %4264 = vmatmul.mubr.msk.bf16.gmra.mxu1 %vm1918_vm7, %v3897_v58  ;;  %v2816_v37 = vsel %vm4704_vm6, %v3920_v20, %v2815_v62  ;;  %v3987_v40 = vrot.slane %v3977_v28, 9  ;;  %v3311_v42 = vrot.slane %v3952_v11, 5  ;;  %v3988_v44 = vrot.slane %v3978_v43, 9  ;;  %v5283_v4 = vld [vmem:[%s4947_s25 + $0x44] sm:$0x1] }
  0xa0   : > { %4279 = vmatprep.mubr.msk.bf16.mxu1 %vm1918_vm7, %v4410_v18  ;;  %v3315_v46 = vrot.slane %v3954_v13, 5  ;;  %v3319_v47 = vrot.slane %v3956_v61, 5  ;;  %v3073_v21 = vshll.u32 %v3950_v22, 16  ;;  %v5249_v25 = vsel %vm4704_vm6, %v3986_v35, %v3307_v41  ;;  %v4415_v18 = vld [vmem:[%s4947_s25 + $0x40] ss:$8 sps:$4 sm:$0xff]  }
  0xa1   : > { %v5253_v50 = vsel %vm4704_vm6, %v3987_v40, %v3311_v42  ;;  %v3989_v52 = vrot.slane %v3979_v30, 9  ;;  %v3087_v56 = vshll.u32 %v3952_v11, 16  ;;  %v3924_v51 = vcombine.low %v2812_v31, %v2816_v37  ;;  %v3983_v37 = vld [vmem:[%s4947_s25 + $0x48] sm:$0xe]  ;;  %v3957_v30 = vld [vmem:[%s4947_s25 + $0x30] sm:$0xf] }
  0xa2   : > { %v3994_v39 = vcombine.low %v5249_v25, %v5253_v50  ;;  %v3064_v26 = vshrl.u32 %v3949_v54, 16  ;;  %v3067_v57 = vshll.u32 %v3949_v54, 16  ;;  %v5263_v60 = vsel %vm4704_vm6, %v3988_v44, %v3315_v46 }
  0xa3   : > { %v5267_v2 = vsel %vm4704_vm6, %v3989_v52, %v3319_v47  ;;  %v3075_v1 = vrot.slane %v3073_v21, 5  ;;  %v3089_v8 = vrot.slane %v3087_v56, 5  ;;  %v3092_v58 = vshrl.u32 %v3953_v59, 16 }
  0xa4   : > { %v3066_v48 = vrot.slane %v3064_v26, 4  ;;  %v3069_v0 = vrot.slane %v3067_v57, 5  ;;  %v3095_v24 = vshll.u32 %v3953_v59, 16  ;;  %v3101_v53 = vshll.u32 %v3954_v13, 16  ;;  %v3961_v26 = vld [vmem:[%s4947_s25 + $0x40] sm:$0xf] }
  0xa5   : > { %4270 = vmatmul.mubr.msk.bf16.vlgmr.msra.gmra.mxu0 %vm1918_vm7, %v3922_v17  ;;  %v3109_v9 = vshll.u32 %v3955_v7, 16  ;;  %v3980_v17 = vld [vmem:[%s4947_s25 + $0x30] sm:$0xe]  ;;  %v3094_v15 = vrot.slane %v3092_v58, 4  ;;  %v3115_v16 = vshll.u32 %v3956_v61, 16  ;;  %v3323_v35 = vrot.slane %v5274_v10, 5 }
  0xa6   : > { %4288 = vmatpush3.bf16.msra.mxu0 %v5167_v14  ;;  %4273 = vmatprep.mubr.msk.bf16.mxu0 %vm1918_vm7, %v3923_v29  ;;  %v3951_v14 = vld [vmem:[%s4947_s25 + $0x18] sm:$0xf]  ;;  %v3070_v19 = vor.u32 %v3069_v0, %v3066_v48  ;;  %v3097_v49 = vrot.slane %v3095_v24, 5  ;;  %v3103_v62 = vrot.slane %v3101_v53, 5  ;;  %v3990_v28 = vrot.slane %v3980_v17, 9 }
  0xa7   : > { %4280 = vmatmul.mubr.msk.bf16.vlgmr.msra.gmra.mxu1 %vm1918_vm7, %v4411_v5  ;;  %v3078_v33 = vshrl.u32 %v3951_v14, 16  ;;  %v3081_v63 = vshll.u32 %v3951_v14, 16  ;;  %v3111_v5 = vrot.slane %v3109_v9, 5  ;;  %v3117_v27 = vrot.slane %v3115_v16, 5  ;;  %v5290_v61 = vld [vmem:[%s4947_s25 + $0x4c] sm:$0x1] }
  0xa8   : > { %4298 = vmatpush3.bf16.msra.mxu1 %v5178_v34  ;;  %4283 = vmatprep.mubr.msk.bf16.mxu1 %vm1918_vm7, %v4414_v55  ;;  %v3106_v34 = vshrl.u32 %v3955_v7, 16  ;;  %v3071_v20 = vrot.slane %v3070_v19, 4  ;;  %v3098_v11 = vor.u32 %v3097_v49, %v3094_v15  ;;  %v3982_v55 = vld [vmem:[%s4947_s25 + $0x40] sm:$0xe]  ;;  %v3991_v13 = vrot.slane %v3981_v32, 9 }
  0xa9   : > { %v3080_v38 = vrot.slane %v3078_v33, 4  ;;  %v3083_v6 = vrot.slane %v3081_v63, 5  ;;  %v3327_v42 = vrot.slane %v5277_v12, 5  ;;  %v3992_v43 = vrot.slane %v3982_v55, 9  ;;  %v3959_v14 = vld [vmem:[%s4947_s25 + $0x38] sm:$0xf] }
  0xaa   : > { %v3108_v22 = vrot.slane %v3106_v34, 4  ;;  %v3076_v29 = vsel %vm4638_vm3, %v3071_v20, %v3075_v1  ;;  %v3099_v40 = vrot.slane %v3098_v11, 4  ;;  %v3324_v47 = vsel %vm4704_vm6, %v3990_v28, %v3323_v35 }
  0xab   : > { %v3084_v3 = vor.u32 %v3083_v6, %v3080_v38  ;;  %v3331_v21 = vrot.slane %v5283_v4, 5  ;;  %v3328_v50 = vsel %vm4704_vm6, %v3991_v13, %v3327_v42  ;;  %v3993_v52 = vrot.slane %v3983_v37, 9 }
  0xac   : > { %v3112_v31 = vor.u32 %v3111_v5, %v3108_v22  ;;  %v3104_v25 = vsel %vm4638_vm3, %v3099_v40, %v3103_v62  ;;  %v3335_v54 = vrot.slane %v5290_v61, 5  ;;  %v3995_v56 = vcombine.low %v5263_v60, %v5267_v2 }
  0xad   : > { %4274 = vmatmul.mubr.msk.bf16.gmra.mxu0 %vm1918_vm7, %v3924_v51  ;;  %v3085_v45 = vrot.slane %v3084_v3, 4  ;;  %v3996_v59 = vcombine.low %v3324_v47, %v3328_v50  ;;  %v3123_v33 = vshll.u32 %v3957_v30, 16  ;;  %v3129_v63 = vshll.u32 %v5274_v10, 16 }
  0xae   : > { %v3113_v46 = vrot.slane %v3112_v31, 4  ;;  %v3332_v7 = vsel %vm4704_vm6, %v3992_v43, %v3331_v21  ;;  %v3134_v0 = vshrl.u32 %v3959_v14, 16  ;;  %v3137_v1 = vshll.u32 %v3959_v14, 16 }
  0xaf   : > { %4284 = vmatmul.mubr.msk.bf16.gmra.mxu1 %vm1918_vm7, %v4415_v18  ;;  %v3090_v41 = vsel %vm4638_vm3, %v3085_v45, %v3089_v8  ;;  %v3963_v8 = vld [vmem:[%s4947_s25 + $0x48] sm:$0xf]  ;;  %v3336_v60 = vsel %vm4704_vm6, %v3993_v52, %v3335_v54  ;;  %v3125_v2 = vrot.slane %v3123_v33, 5  ;;  %v3143_v18 = vshll.u32 %v5277_v12, 16 }
  0xb0   : > { %4299 = vmatprep.mubr.msk.bf16.mxu1 %vm1918_vm7, %v3994_v39  ;;  %v3967_v44 = vcombine.low %v3076_v29, %v3090_v41  ;;  %v3118_v51 = vsel %vm4638_vm3, %v3113_v46, %v3117_v27  ;;  %v3120_v39 = vshrl.u32 %v3957_v30, 16  ;;  %v3148_v38 = vshrl.u32 %v3961_v26, 16 }
  0xb1   : > { %v3968_v57 = vcombine.low %v3104_v25, %v3118_v51  ;;  %v3136_v6 = vrot.slane %v3134_v0, 4  ;;  %v3139_v58 = vrot.slane %v3137_v1, 5  ;;  %v3151_v24 = vshll.u32 %v3961_v26, 16 }
  0xb2   : > { %4289 = vmatprep.mubr.msk.bf16.mxu0 %vm1918_vm7, %v3967_v44  ;;  %v3122_v48 = vrot.slane %v3120_v39, 4  ;;  %v3157_v10 = vshll.u32 %v5283_v4, 16  ;;  %v3131_v53 = vrot.slane %v3129_v63, 5  ;;  %v3150_v34 = vrot.slane %v3148_v38, 4 }
  0xb3   : > { %v3162_v9 = vshrl.u32 %v3963_v8, 16  ;;  %v3140_v17 = vor.u32 %v3139_v58, %v3136_v6  ;;  %v3145_v23 = vrot.slane %v3143_v18, 5  ;;  %v3153_v3 = vrot.slane %v3151_v24, 5 }
  0xb4   : > { %v3126_v19 = vor.u32 %v3125_v2, %v3122_v48  ;;  %v3165_v15 = vshll.u32 %v3963_v8, 16  ;;  %v3171_v16 = vshll.u32 %v5290_v61, 16  ;;  %v3159_v62 = vrot.slane %v3157_v10, 5 }
  0xb5   : > { %4290 = vmatmul.mubr.msk.bf16.vlgmr.msra.gmra.mxu0 %vm1918_vm7, %v3968_v57  ;;  %v3164_v12 = vrot.slane %v3162_v9, 4  ;;  %v3141_v32 = vrot.slane %v3140_v17, 4  ;;  %v3154_v20 = vor.u32 %v3153_v3, %v3150_v34  ;;  %v3997_v5 = vcombine.low %v3332_v7, %v3336_v60 }
  0xb6   : > { %v3127_v49 = vrot.slane %v3126_v19, 4  ;;  %v3167_v22 = vrot.slane %v3165_v15, 5  ;;  %v3173_v28 = vrot.slane %v3171_v16, 5 }
  0xb7   : > { %4300 = vmatmul.mubr.msk.bf16.vlgmr.msra.gmra.mxu1 %vm1918_vm7, %v3995_v56  ;;  %v3146_v45 = vsel %vm4638_vm3, %v3141_v32, %v3145_v23  ;;  %v3155_v11 = vrot.slane %v3154_v20, 4 }
  0xb8   : > { %4303 = vmatprep.mubr.msk.bf16.mxu1 %vm1918_vm7, %v3996_v59  ;;  %v3132_v4 = vsel %vm4638_vm3, %v3127_v49, %v3131_v53  ;;  %v3168_v27 = vor.u32 %v3167_v22, %v3164_v12 }
  0xb9   : > { %v3969_v55 = vcombine.low %v3132_v4, %v3146_v45  ;;  %v3160_v29 = vsel %vm4638_vm3, %v3155_v11, %v3159_v62 }
  0xba   : > { %v3169_v31 = vrot.slane %v3168_v27, 4 }
  0xbb   : > { %4293 = vmatprep.mubr.msk.bf16.mxu0 %vm1918_vm7, %v3969_v55 }
  0xbc   : > { %v3174_v35 = vsel %vm4638_vm3, %v3169_v31, %v3173_v28 }
  0xbd   : > { %v3970_v13 = vcombine.low %v3160_v29, %v3174_v35 }
  0xbf   : > { %4304 = vmatmul.mubr.msk.bf16.gmra.mxu1 %vm1918_vm7, %v3997_v5  ;;  %4294 = vmatmul.mubr.msk.bf16.gmra.mxu0 %vm1918_vm7, %v3970_v13 }
  0xe2   : > { %v4127_v61 = vpop.f32.mrf.mxu1 }
  0xe4   : > { %v584_v37 = vpop.f32.mrf.mxu1 }
  0xe6   : > { %v4128_v41 = vpop.f32.mrf.mxu1 }
  0xe8   : > { %v587_v40 = vpop.f32.mrf.mxu1 }
  0xea   : > { %v4115_v42 = vpop.f32.mrf.mxu0 }
  0xeb   : > { %v593_v43 = vadd.f32 %v4127_v61, %v4115_v42  ;;  %v4131_v44 = vpop.f32.mrf.mxu1 }
  0xec   : > { %v475_v30 = vpop.f32.mrf.mxu0 }
  0xed   : > { %v585_v46 = vadd.f32 %v584_v37, %v475_v30  ;;  %v600_v21 = vpop.f32.mrf.mxu1 }
  0xee   : > { %v4116_v47 = vpop.f32.mrf.mxu0 }
  0xef   : > { %v596_v25 = vadd.f32 %v4128_v41, %v4116_v47  ;;  %v4132_v52 = vpop.f32.mrf.mxu1 }
  0xf0   : > { %v478_v50 = vpop.f32.mrf.mxu0 }
  0xf1   : > { %v588_v54 = vadd.f32 %v587_v40, %v478_v50  ;;  %v603_v36 = vpop.f32.mrf.mxu1 }
  0xf3   : > { %v4151_v14 = vpop.f32.mrf.mxu1 }
  0xf4   : > { %v4119_v56 = vpop.f32.mrf.mxu0 }
  0xf5   : > { %v609_v51 = vadd.f32 %v4131_v44, %v4119_v56  ;;  %v883_v39 = vpop.f32.mrf.mxu1 }
  0xf6   : > { %v491_v26 = vpop.f32.mrf.mxu0 }
  0xf7   : > { %v601_v57 = vadd.f32 %v600_v21, %v491_v26  ;;  %v4152_v59 = vpop.f32.mrf.mxu1 }
  0xf8   : > { %v4120_v33 = vpop.f32.mrf.mxu0 }
  0xf9   : > { %v612_v63 = vadd.f32 %v4132_v52, %v4120_v33  ;;  %v886_v7 = vpop.f32.mrf.mxu1 }
  0xfa   : > { %v494_v48 = vpop.f32.mrf.mxu0 }
  0xfb   : > { %v604_v0 = vadd.f32 %v603_v36, %v494_v48  ;;  %v4155_v1 = vpop.f32.mrf.mxu1 }
  0xfc   : > { %v4139_v8 = vpop.f32.mrf.mxu0 }
  0xfd   : > { %v782_v60 = vadd.f32 %v4139_v8, %v593_v43  ;;  %v899_v2 = vpop.f32.mrf.mxu1 }
  0xfe   : > { %v749_v18 = vpop.f32.mrf.mxu0 }
  0xff   : > { %v780_v38 = vadd.f32 %v749_v18, %v585_v46  ;;  %v4156_v6 = vpop.f32.mrf.mxu1  ;;  %v916_v58 = vadd.f32 %v4151_v14, %v782_v60 }
 0x100   : > { %v4140_v24 = vpop.f32.mrf.mxu0 }
 0x101   : > { %v783_v10 = vadd.f32 %v4140_v24, %v596_v25  ;;  %v902_v19 = vpop.f32.mrf.mxu1  ;;  %v914_v53 = vadd.f32 %v883_v39, %v780_v38 }
 0x102   : > { %v752_v34 = vpop.f32.mrf.mxu0 }
 0x103   : > { %v781_v9 = vadd.f32 %v752_v34, %v588_v54  ;;  %v917_v17 = vadd.f32 %v4152_v59, %v783_v10  ;;  %v4175_v15 = vpop.f32.mrf.mxu1 }
 0x104   : > { %v4143_v23 = vpop.f32.mrf.mxu0 }
 0x105   : > { %v786_v3 = vadd.f32 %v4143_v23, %v609_v51  ;;  %v915_v49 = vadd.f32 %v886_v7, %v781_v9  ;;  %v1295_v22 = vpop.f32.mrf.mxu1 }
 0x106   : > { %v765_v12 = vpop.f32.mrf.mxu0 }
 0x107   : > { %v784_v16 = vadd.f32 %v765_v12, %v601_v57  ;;  %v920_v32 = vadd.f32 %v4155_v1, %v786_v3  ;;  %v4176_v28 = vpop.f32.mrf.mxu1 }
 0x108   : > { %v4144_v20 = vpop.f32.mrf.mxu0 }
 0x109   : > { %v787_v62 = vadd.f32 %v4144_v20, %v612_v63  ;;  %v918_v5 = vadd.f32 %v899_v2, %v784_v16  ;;  %v1298_v61 = vpop.f32.mrf.mxu1 }
 0x10a   : > { %v768_v4 = vpop.f32.mrf.mxu0 }
 0x10b   : > { %v785_v45 = vadd.f32 %v768_v4, %v604_v0  ;;  %v921_v11 = vadd.f32 %v4156_v6, %v787_v62  ;;  %v4179_v44 = vpop.f32.mrf.mxu1 }
 0x10c   : > { %v4163_v27 = vpop.f32.mrf.mxu0 }
 0x10d   : > { %v919_v55 = vadd.f32 %v902_v19, %v785_v45  ;;  %v1158_v29 = vadd.f32 %v4163_v27, %v916_v58  ;;  %v1311_v47 = vpop.f32.mrf.mxu1 }
 0x10e   : > { %v1125_v31 = vpop.f32.mrf.mxu0 }
 0x10f   : > { %v1156_v35 = vadd.f32 %v1125_v31, %v914_v53  ;;  %v5337_v13 = vadd.f32 %v4175_v15, %v1158_v29  ;;  %v4180_v50 = vpop.f32.mrf.mxu1 }
 0x110   : > { %v4164_v37 = vpop.f32.mrf.mxu0 }
 0x111   : > { %v1159_v41 = vadd.f32 %v4164_v37, %v917_v17  ;;  %v5339_v40 = vadd.f32 %v1295_v22, %v1156_v35  ;;  %v1314_v39 = vpop.f32.mrf.mxu1 }
 0x112   : > { %v1128_v42 = vpop.f32.mrf.mxu0 }
 0x113   : > { %v1157_v43 = vadd.f32 %v1128_v42, %v915_v49  ;;  %v5341_v30 = vadd.f32 %v4176_v28, %v1159_v41 }
 0x115   : > { %v5343_v46 = vadd.f32 %v1298_v61, %v1157_v43 }
 0x117   : > { %v4167_v21 = vpop.f32.mrf.mxu0 }
 0x118   : > { %v1162_v25 = vadd.f32 %v4167_v21, %v920_v32 }
 0x119   : > { %v1141_v52 = vpop.f32.mrf.mxu0 }
 0x11a   : > { %v1160_v54 = vadd.f32 %v1141_v52, %v918_v5  ;;  %v1332_v36 = vadd.f32 %v4179_v44, %v1162_v25 }
 0x11b   : > { %v4168_v14 = vpop.f32.mrf.mxu0 }
 0x11c   : > { %v1163_v56 = vadd.f32 %v4168_v14, %v921_v11  ;;  %v1330_v51 = vadd.f32 %v1311_v47, %v1160_v54 }
 0x11d   : > { %v1144_v26 = vpop.f32.mrf.mxu0 }
 0x11e   : > { %v1161_v57 = vadd.f32 %v1144_v26, %v919_v55  ;;  %v1333_v59 = vadd.f32 %v4180_v50, %v1163_v56 }
 0x11f   : > { %v4187_v33 = vpop.f32.mrf.mxu0 }
 0x120   : > { %v1331_v63 = vadd.f32 %v1314_v39, %v1161_v57 }
 0x121   : > { %v5345_v7 = vpop.f32.mrf.mxu1  ;;  %v1429_v48 = vpop.f32.mrf.mxu0 }
 0x123   : > { %v5347_v0 = vpop.f32.mrf.mxu1  ;;  %v5349_v1 = vpop.f32.mrf.mxu0 }
 0x125   : > { %v5351_v8 = vpop.f32.mrf.mxu1  ;;  %v5353_v60 = vpop.f32.mrf.mxu0 }
 0x127   : > { %v4191_v2 = vpop.f32.mrf.mxu0  ;;  %v5355_v18 = vpop.f32.mrf.mxu1 }
 0x128   : > { %v1466_v38 = vadd.f32 %v4191_v2, %v1332_v36 }
 0x129   : > { %v1445_v6 = vpop.f32.mrf.mxu0 }
 0x12a   : > { %v1464_v58 = vadd.f32 %v1445_v6, %v1330_v51  ;;  %v4203_v10 = vpop.f32.mrf.mxu1 }
 0x12b   : > { %v4192_v24 = vpop.f32.mrf.mxu0  ;;  %v5357_v34 = vadd.f32 %v4203_v10, %v1466_v38  ;;  %v1462_v38 = vadd.f32 %v4187_v33, %v5337_v13 }
 0x12c   : > { %v1467_v19 = vadd.f32 %v4192_v24, %v1333_v59  ;;  %v1687_v9 = vpop.f32.mrf.mxu1  ;;  %v1460_v24 = vadd.f32 %v1429_v48, %v5339_v40 }
 0x12d   : > { %v1448_v53 = vpop.f32.mrf.mxu0  ;;  %v5359_v3 = vadd.f32 %v1687_v9, %v1464_v58  ;;  %v1704_v9 = vadd.f32 %v5345_v7, %v1462_v38 }
 0x12e   : > { %v1465_v17 = vadd.f32 %v1448_v53, %v1331_v63  ;;  %v4204_v15 = vpop.f32.mrf.mxu1  ;;  %v1463_v53 = vadd.f32 %v5349_v1, %v5341_v30  ;;  %v1702_v33 = vadd.f32 %v5347_v0, %v1460_v24 }
 0x12f   : > { %v4211_v23 = vpop.f32.mrf.mxu0  ;;  %v5361_v12 = vadd.f32 %v4204_v15, %v1467_v19  ;;  %v1461_v15 = vadd.f32 %v5353_v60, %v5343_v46 }
 0x130   : > { %v1690_v16 = vpop.f32.mrf.mxu1  ;;  %v1874_v13 = vadd.f32 %v4211_v23, %v1704_v9 }
 0x131   : > { %v1841_v49 = vpop.f32.mrf.mxu0  ;;  %v5363_v20 = vadd.f32 %v1690_v16, %v1465_v17  ;;  %v1703_v1 = vadd.f32 %v5355_v18, %v1461_v15 }
 0x132   : > { %v4221_v62 = vpop.f32.mrf.mxu1  ;;  %v1872_v48 = vadd.f32 %v1841_v49, %v1702_v33 }
 0x133   : > { %v4212_v32 = vpop.f32.mrf.mxu0  ;;  %v1998_v38 = vadd.f32 %v4221_v62, %v1874_v13 }
 0x134   : > { %v1965_v5 = vpop.f32.mrf.mxu1 }
 0x135   : > { %v1844_v22 = vpop.f32.mrf.mxu0  ;;  %v1996_v23 = vadd.f32 %v1965_v5, %v1872_v48 }
 0x136   : > { %v4222_v45 = vpop.f32.mrf.mxu1  ;;  %v1873_v60 = vadd.f32 %v1844_v22, %v1703_v1 }
 0x137   : > { %v5365_v4 = vpop.f32.mrf.mxu0 }
 0x138   : > { %v1968_v27 = vpop.f32.mrf.mxu1  ;;  %v1878_v22 = vadd.f32 %v5365_v4, %v5357_v34 }
 0x139   : > { %v5367_v11 = vpop.f32.mrf.mxu0 }
 0x13a   : > { %v5371_v55 = vpop.f32.mrf.mxu1 }
 0x13b   : > { %v5369_v28 = vpop.f32.mrf.mxu0  ;;  %v2002_v34 = vadd.f32 %v5371_v55, %v1878_v22 }
 0x13c   : > { %v5373_v29 = vpop.f32.mrf.mxu1 }
 0x13d   : > { %v5375_v31 = vpop.f32.mrf.mxu0 }
 0x13e   : > { %v5377_v35 = vpop.f32.mrf.mxu1 }
 0x13f   : > { %v4231_v37 = vpop.f32.mrf.mxu0 }
 0x140   : > { %v5379_v61 = vpop.f32.mrf.mxu1  ;;  %v2232_v0 = vadd.f32 %v4231_v37, %v1998_v38 }
 0x141   : > { %v2199_v42 = vpop.f32.mrf.mxu0 }
 0x142   : > { %v4241_v41 = vpop.f32.mrf.mxu1  ;;  %v2230_v49 = vadd.f32 %v2199_v42, %v1996_v23 }
 0x143   : > { %v4232_v47 = vpop.f32.mrf.mxu0 }
 0x144   : > { %v2361_v43 = vpop.f32.mrf.mxu1 }
 0x145   : > { %v2202_v50 = vpop.f32.mrf.mxu0  ;;  %v2392_v15 = vadd.f32 %v2361_v43, %v2230_v49  ;;  %v1879_v43 = vadd.f32 %v5369_v28, %v5361_v12 }
 0x146   : > { %v4242_v44 = vpop.f32.mrf.mxu1 }
 0x148   : > { %v5381_v21 = vpop.f32.mrf.mxu1 }
 0x14a   : > { %v5383_v25 = vpop.f32.mrf.mxu1 }
 0x14c   : > { %v5385_v52 = vpop.f32.mrf.mxu1 }
 0x14d   : > { %v5387_v54 = vpop.f32.mrf.mxu0 }
 0x14e   : > { %v5389_v36 = vpop.f32.mrf.mxu1 }
 0x14f   : > { %5586 = vst [vmem:[#allocation5_spill] sm:$0xff] %v5389_v36  ;;  %v5391_v14 = vpop.f32.mrf.mxu0 }
 0x150   : > { %v5395_v51 = vpop.f32.mrf.mxu1 }
 0x151   : > { %v5393_v56 = vpop.f32.mrf.mxu0  ;;  %5587 = vst [vmem:[#allocation6_spill] sm:$0xff] %v5395_v51  ;;  %v1705_v51 = vadd.f32 %v5351_v8, %v1463_v53 }
 0x153   : > { %v5397_v39 = vpop.f32.mrf.mxu0  ;;  %v1875_v7 = vadd.f32 %v4212_v32, %v1705_v51 }
 0x155   : > { %v4251_v26 = vpop.f32.mrf.mxu0  ;;  %v4261_v57 = vpop.f32.mrf.mxu1  ;;  %v1999_v33 = vadd.f32 %v4222_v45, %v1875_v7  ;;  %v1876_v45 = vadd.f32 %v5367_v11, %v5359_v3  ;;  %v1877_v3 = vadd.f32 %v5375_v31, %v5363_v20  ;;  %v2236_v11 = vadd.f32 %v5387_v54, %v2002_v34 }
 0x157   : > { %v2485_v59 = vpop.f32.mrf.mxu0  ;;  %v2719_v63 = vpop.f32.mrf.mxu1  ;;  %v2001_v54 = vadd.f32 %v5379_v61, %v1877_v3  ;;  %v5471_v61 = vld [vmem:[%s5578_s4] ss:$0 sm:$0xff] }
 0x158   : > { %v2516_v13 = vadd.f32 %v2485_v59, %v2392_v15 }
 0x159   : > { %v4252_v2 = vpop.f32.mrf.mxu0  ;;  %v5400_v6 = vpop.f32.mrf.mxu1  ;;  %v2235_v38 = vadd.f32 %v5397_v39, %v2001_v54 }
 0x15a   : > { %v2750_v59 = vadd.f32 %v2719_v63, %v2516_v13 }
 0x15b   : > { %v2488_v58 = vpop.f32.mrf.mxu0  ;;  %v5403_v10 = vpop.f32.mrf.mxu1 }
 0x15d   : > { %v5405_v19 = vpop.f32.mrf.mxu0 }
 0x15f   : > { %v5410_v17 = vpop.f32.mrf.mxu0  ;;  %v5415_v16 = vpop.f32.mrf.mxu1 }
 0x160   : > { %5588 = vst [vmem:[#allocation7_spill] sm:$0xff] %v5410_v17  ;;  %5589 = vst [vmem:[#allocation8_spill] sm:$0xff] %v5415_v16  ;;  %v1997_v16 = vadd.f32 %v1968_v27, %v1873_v60 }
 0x161   : > { %v5417_v40 = vpop.f32.mrf.mxu0  ;;  %v5420_v36 = vpop.f32.mrf.mxu1 }
 0x162   : > { %5590 = vst [vmem:[#allocation9_spill] sm:$0xff] %v5420_v36  ;;  %v2233_v36 = vadd.f32 %v4232_v47, %v1999_v33  ;;  %v2231_v18 = vadd.f32 %v2202_v50, %v1997_v16  ;;  %v5593_v33 = vld [vmem:[#allocation5_spill] sm:$0xff] }
 0x163   : > { %v5422_v30 = vpop.f32.mrf.mxu0  ;;  %v5425_v17 = vpop.f32.mrf.mxu1 }
 0x164   : > { %5591 = vst [vmem:[#allocation10_spill] sm:$0xff] %v5422_v30  ;;  %v2394_v30 = vadd.f32 %v4241_v41, %v2232_v0  ;;  %v2395_v48 = vadd.f32 %v4242_v44, %v2233_v36  ;;  %v2393_v41 = vadd.f32 %v5381_v21, %v2231_v18  ;;  %v2000_v21 = vadd.f32 %v5373_v29, %v1876_v45 }
 0x165   : > { %v4271_v46 = vpop.f32.mrf.mxu0  ;;  %v5427_v24 = vpop.f32.mrf.mxu1 }
 0x166   : > { %v2518_v62 = vadd.f32 %v4251_v26, %v2394_v30  ;;  %v2519_v27 = vadd.f32 %v4252_v2, %v2395_v48  ;;  %v2517_v44 = vadd.f32 %v2488_v58, %v2393_v41  ;;  %v2234_v55 = vadd.f32 %v5391_v14, %v2000_v21 }
 0x167   : > { %v2881_v9 = vpop.f32.mrf.mxu0  ;;  %v4281_v8 = vpop.f32.mrf.mxu1  ;;  %v2003_v58 = vadd.f32 %v5377_v35, %v1879_v43  ;;  %v2398_v30 = vadd.f32 %v5383_v25, %v2236_v11  ;;  %v5595_v22 = vld [vmem:[#allocation8_spill] sm:$0xff] }
 0x168   : > { %v2752_v50 = vadd.f32 %v4261_v57, %v2518_v62  ;;  %v2912_v12 = vadd.f32 %v2881_v9, %v2750_v59  ;;  %v2753_v28 = vadd.f32 %v5400_v6, %v2519_v27  ;;  %v2751_v20 = vadd.f32 %v5403_v10, %v2517_v44  ;;  %v5592_v9 = vld [vmem:[#allocation7_spill] sm:$0xff]  ;;  %v5594_v62 = vld [vmem:[#allocation6_spill] sm:$0xff] }
 0x169   : > { %v4272_v53 = vpop.f32.mrf.mxu0  ;;  %v3005_v32 = vpop.f32.mrf.mxu1  ;;  %v2237_v29 = vadd.f32 %v5393_v56, %v2003_v58  ;;  %v2396_v10 = vadd.f32 %v5385_v52, %v2234_v55  ;;  %v2397_v15 = vadd.f32 %v5594_v62, %v2235_v38 }
 0x16a   : > { %v2914_v36 = vadd.f32 %v4271_v46, %v2752_v50  ;;  %v2915_v63 = vadd.f32 %v4272_v53, %v2753_v28  ;;  %v3036_v35 = vadd.f32 %v3005_v32, %v2912_v12  ;;  %v2522_v46 = vadd.f32 %v5405_v19, %v2398_v30 }
 0x16b   : > { %v2884_v51 = vpop.f32.mrf.mxu0  ;;  %v4282_v37 = vpop.f32.mrf.mxu1  ;;  %v2520_v49 = vadd.f32 %v5592_v9, %v2396_v10  ;;  %v5596_v43 = vld [vmem:[#allocation10_spill] sm:$0xff] }
 0x16c   : > { %v3038_v31 = vadd.f32 %v4281_v8, %v2914_v36  ;;  %v2913_v1 = vadd.f32 %v2884_v51, %v2751_v20  ;;  %v3039_v23 = vadd.f32 %v4282_v37, %v2915_v63  ;;  %v2399_v8 = vadd.f32 %v5593_v33, %v2237_v29  ;;  %v5597_v36 = vld [vmem:[#allocation9_spill] sm:$0xff] }
 0x16d   : > { %v5431_v5 = vpop.f32.mrf.mxu0  ;;  %v3008_v42 = vpop.f32.mrf.mxu1  ;;  %v2756_v13 = vadd.f32 %v5595_v22, %v2522_v46  ;;  %v2521_v34 = vadd.f32 %v5596_v43, %v2397_v15  ;;  %v2754_v59 = vadd.f32 %v5597_v36, %v2520_v49 }
 0x16e   : > { %v3037_v51 = vadd.f32 %v3008_v42, %v2913_v1  ;;  %v2523_v18 = vadd.f32 %v5417_v40, %v2399_v8 }
 0x16f   : > { %v5435_v47 = vpop.f32.mrf.mxu0  ;;  %v5441_v4 = vpop.f32.mrf.mxu1  ;;  %v2918_v44 = vadd.f32 %v5431_v5, %v2756_v13  ;;  %v2755_v20 = vadd.f32 %v5427_v24, %v2521_v34 }
 0x170   : > { %v2757_v12 = vadd.f32 %v5425_v17, %v2523_v18  ;;  %v2916_v55 = vadd.f32 %v5435_v47, %v2754_v59 }
 0x171   : > { %v5443_v26 = vpop.f32.mrf.mxu0  ;;  %v5449_v57 = vpop.f32.mrf.mxu1  ;;  %v3042_v29 = vadd.f32 %v5441_v4, %v2918_v44 }
 0x173   : > { %v5451_v2 = vpop.f32.mrf.mxu0  ;;  %v5456_v16 = vpop.f32.mrf.mxu1 }
 0x175   : > { %v5462_v7 = vpop.f32.mrf.mxu1  ;;  %v4291_v6 = vpop.f32.mrf.mxu0 }
 0x176   : > { %v3272_v14 = vadd.f32 %v4291_v6, %v3038_v31  ;;  %v2919_v31 = vadd.f32 %v5443_v26, %v2757_v12  ;;  %v2917_v6 = vadd.f32 %v5451_v2, %v2755_v20 }
 0x177   : > { %v4301_v60 = vpop.f32.mrf.mxu1  ;;  %v3239_v25 = vpop.f32.mrf.mxu0 }
 0x178   : > { %v3434_v56 = vadd.f32 %v4301_v60, %v3272_v14  ;;  %v3270_v0 = vadd.f32 %v3239_v25, %v3036_v35  ;;  %v3040_v35 = vadd.f32 %v5449_v57, %v2916_v55  ;;  %v3043_v46 = vadd.f32 %v5456_v16, %v2919_v31 }
 0x179   : > { %v3401_v39 = vpop.f32.mrf.mxu1  ;;  %v4292_v53 = vpop.f32.mrf.mxu0 }
 0x17a   : > { %v3448_v52 = vadd.f32 %v5471_v61, %v3434_v56  ;;  %v3432_v19 = vadd.f32 %v3401_v39, %v3270_v0  ;;  %v3273_v32 = vadd.f32 %v4292_v53, %v3039_v23  ;;  %v3041_v56 = vadd.f32 %v5462_v7, %v2917_v6 }
 0x17b   : > { %v4302_v37 = vpop.f32.mrf.mxu1  ;;  %v3242_v48 = vpop.f32.mrf.mxu0 }
 0x17c   : > { %v3456_v45 = vmax.f32 %v3448_v52, 0.0  ;;  %v3446_v27 = vadd.f32 %v5471_v61, %v3432_v19  ;;  %v3435_v41 = vadd.f32 %v4302_v37, %v3273_v32  ;;  %v3271_v50 = vadd.f32 %v3242_v48, %v3037_v51 }
 0x17d   : > { %v3404_v42 = vpop.f32.mrf.mxu1 }
 0x17e   : > { %v3464_v40 = vpack.c.bf16 %v3456_v45, %v3456_v45  ;;  %v3454_v3 = vmax.f32 %v3446_v27, 0.0  ;;  %v3449_v11 = vadd.f32 %v5471_v61, %v3435_v41  ;;  %v3433_v21 = vadd.f32 %v3404_v42, %v3271_v50 }
 0x17f   : > { %v4305_v28 = vpop.f32.mrf.mxu1  ;;  %v4295_v30 = vpop.f32.mrf.mxu0 }
 0x180   : > { %3473 = vst.msk [vmem:[%s5488_s16 + $0x8] sm:$0xf] %vm3470_vm8, %v3464_v40  ;;  %v3462_v5 = vpack.c.bf16 %v3454_v3, %v3454_v3  ;;  %v3457_v58 = vmax.f32 %v3449_v11, 0.0  ;;  %v3447_v63 = vadd.f32 %v5471_v61, %v3433_v21  ;;  %v3276_v14 = vadd.f32 %v4295_v30, %v3042_v29 }
 0x181   : > { %v3417_v54 = vpop.f32.mrf.mxu1  ;;  %v3255_v38 = vpop.f32.mrf.mxu0 }
 0x182   : > { %3471 = vst.msk [vmem:[%s5488_s16] sm:$0xf] %vm3470_vm8, %v3462_v5  ;;  %v3465_v17 = vpack.c.bf16 %v3457_v58, %v3457_v58  ;;  %v3455_v47 = vmax.f32 %v3447_v63, 0.0  ;;  %v3438_v24 = vadd.f32 %v4305_v28, %v3276_v14  ;;  %v3274_v26 = vadd.f32 %v3255_v38, %v3040_v35 }
 0x183   : > { %v4306_v10 = vpop.f32.mrf.mxu1  ;;  %v4296_v4 = vpop.f32.mrf.mxu0 }
 0x184   : > { %3474 = vst.msk [vmem:[%s5488_s16 + $0xc] sm:$0xf] %vm3470_vm8, %v3465_v17  ;;  %v3463_v1 = vpack.c.bf16 %v3455_v47, %v3455_v47  ;;  %v3452_v60 = vadd.f32 %v5471_v61, %v3438_v24  ;;  %v3436_v25 = vadd.f32 %v3417_v54, %v3274_v26  ;;  %v3277_v2 = vadd.f32 %v4296_v4, %v3043_v46 }
 0x185   : > { %v3258_v0 = vpop.f32.mrf.mxu0  ;;  %v3420_v33 = vpop.f32.mrf.mxu1 }
 0x186   : > { %3472 = vst.msk [vmem:[%s5488_s16 + $0x4] sm:$0xf] %vm3470_vm8, %v3463_v1  ;;  %v3460_v57 = vmax.f32 %v3452_v60, 0.0  ;;  %v3450_v23 = vadd.f32 %v5471_v61, %v3436_v25  ;;  %v3439_v9 = vadd.f32 %v4306_v10, %v3277_v2  ;;  %v3275_v49 = vadd.f32 %v3258_v0, %v3041_v56 }
 0x188   : > { %v3468_v16 = vpack.c.bf16 %v3460_v57, %v3460_v57  ;;  %v3458_v8 = vmax.f32 %v3450_v23, 0.0  ;;  %v3453_v39 = vadd.f32 %v5471_v61, %v3439_v9  ;;  %v3437_v53 = vadd.f32 %v3420_v33, %v3275_v49 }
 0x18a   : > { %3477 = vst.msk [vmem:[%s5488_s16 + $0x18] sm:$0xf] %vm3470_vm8, %v3468_v16  ;;  %v3466_v7 = vpack.c.bf16 %v3458_v8, %v3458_v8  ;;  %v3461_v52 = vmax.f32 %v3453_v39, 0.0  ;;  %v3451_v19 = vadd.f32 %v5471_v61, %v3437_v53 }
 0x18c   : > { %3475 = vst.msk [vmem:[%s5488_s16 + $0x10] sm:$0xf] %vm3470_vm8, %v3466_v7  ;;  %v3469_v32 = vpack.c.bf16 %v3461_v52, %v3461_v52  ;;  %v3459_v51 = vmax.f32 %v3451_v19, 0.0 }
 0x18e   : > { %3478 = vst.msk [vmem:[%s5488_s16 + $0x1c] sm:$0xf] %vm3470_vm8, %v3469_v32  ;;  %v3467_v18 = vpack.c.bf16 %v3459_v51, %v3459_v51 }
 0x190   : > { %3476 = vst.msk [vmem:[%s5488_s16 + $0x14] sm:$0xf] %vm3470_vm8, %v3467_v18 }
 0x191   : > { %4429 = shalt.err (!%p4426_p5)
}
 0x192   : > { %s4430_s15 = scalar_lea.hbm %s5519_s9, 512  ;;  %s4434_s25 = scalar_lea.hbm %s5579_s5, 1024 }
 0x193   : > { %p4431_p6 = scmp.ne.s32.totalorder %s5519_s9, %s4430_s15  ;;  %p4435_p10 = scmp.lt.s32.totalorder %s5519_s9, %s5579_s5 }
 0x194   : > { %p4436_p11 = scmp.lt.s32.totalorder %s4434_s25, %s4430_s15 }
 0x195   : > { %p4432_p7 = pnand %p4431_p6, %p4567_p4 }
 0x196   : > { %p4437_p12 = por %p4436_p11, %p4435_p10 }
 0x197   : > { %p4433_p9 = pneg %p4432_p7 }
 0x199   : > { %p4438_p13 = pnand %p4437_p12, %p4433_p9 }
 0x19b   : > { %4441 = shalt.err (!%p4438_p13)
}
 0x19c   : > { %s4495_s29 = smov 64   ;;  %s4496_s7 = smov 4  }
 0x19d   : > { %4308 = dma.vmem_to_hbm [thread:$0]  (%p4567_p4), %s5521_s27, 512, %s5519_s9, %s5529_s21, %s4495_s29, %s4495_s29, %s4496_s7  }
 0x19e PF: > { %p4314_p0 = scmp.ge.s32.totalorder %s4492_s23, 2  ;;  %s3510_s8 = sand.u32 1, %s4472_s18  }
 0x19f   : > { %s3511_s10 = scalar_lea.sflag [#allocation3], %s3510_s8 }
 0x1a0   : > { %p4311_p1 = pnand %p4314_p0, %p4574_p8 }
 0x1a2   : > { %p4312_p2 = pneg %p4311_p1 }
 0x1a4   : > { %4467 = dma.done.wait (%p4312_p2), %s3511_s10, 512  }
 0x1a5   : > { %4469 = vsyncadd (%p4312_p2), %s3511_s10, 4294966784  ;;  %s18_s23 = sadd.s32 1, %s4492_s23   ;;  %s5598_s18 = smov %s4476_s19 }
 0x1a6   : > { %p15_p3 = scmp.ge.s32.totalorder %s18_s23, 4   ;;  %s5599_s19 = smov %s4480_s20 }
 0x1a7   : > { %s5600_s20 = smov %s4580_s6  ;;  %s5601_s21 = smov %s4488_s22 }
 0x1a8   : > { %s5602_s22 = smov %s5604_s26  ;;  %17 = sbr.rel (!%p15_p3) target bundleno = 4 (0x4), region = 100 }
 0x1ad   :  { %3516 = vsyncpa [#allocation3], 1 }
 0x1ae   :  { %3518 = vsyncpa [#allocation3 + $0x1], 1 }

</bundles_post_ra>
